<compile_context>
chip_gen: v5e
topology: v5e:2x2
jax: 0.10.0
libtpu: 0.0.40
codegen_flags: <defaults>
</compile_context>

<pallas_src>
import functools

import jax
import jax.numpy as jnp
from jax import lax
from jax.experimental import pallas as pl
from jax.experimental.pallas import tpu as pltpu


def _round_up(x, m):
    return ((x + m - 1) // m) * m


def _choose_time_block(T, target):
    tb = max(1, min(T, target))
    while T % tb != 0:
        tb -= 1
    return tb


# -----------------------------------------------------------------------------
# Fused kernel, one grid step = one (batch shard, time block):
#   Phase 1: gi = x @ W_ih^T + b_ih  (one MXU matmul over T_blk*Bs rows)
#   Phase 2: GRU recurrence over T_blk steps, h carried in VMEM across grid steps
#   Phase 3: lin1 -> ReLU -> decoder -> log_softmax on this block's rows
# -----------------------------------------------------------------------------
def rnn_fused_kernel(x_ref, wih_t_ref, whh_t_ref, bih_ref, bhh_ref,
                     w1t_ref, b1_ref, w2t_ref, b2_ref,
                     out_ref, hlast_ref,
                     hseq_scr, hcarry_scr):
    T_blk, Bs, E = x_ref.shape
    H = whh_t_ref.shape[0]            # padded hidden size (lane-aligned)
    O = w2t_ref.shape[1]              # padded output size (lane-aligned)

    # New batch shard -> reset the carried hidden state.
    @pl.when(pl.program_id(1) == 0)
    def _():
        hcarry_scr[...] = jnp.zeros_like(hcarry_scr)

    # --- Phase 1: hoisted input projection for this time block (throughput matmul) ---
    x_flat = x_ref[...].reshape(T_blk * Bs, E)
    gi = (jnp.dot(x_flat, wih_t_ref[...],
                  preferred_element_type=jnp.float32) + bih_ref[...])    # (T_blk*Bs, 3H)

    # Hoist the b_hh broadcast out of the unrolled time loop (JAX does not CSE it).
    bhh = jnp.broadcast_to(bhh_ref[...], (Bs, 3 * H))

    # --- Phase 2: serial recurrence, all f32, h lives in vregs within the block. ---
    # T_blk is bounded (<= 16) so a static unroll keeps LLO visibility without code bloat.
    # TODO(synk): at H_pad >= 512 chunk the gate elementwise math over 128-lane H slices
    #             to bound vreg pressure inside the serial loop.
    h = hcarry_scr[...]
    for t in range(T_blk):
        gi_t = gi[t * Bs:(t + 1) * Bs, :]                                 # static slice
        gh = jnp.dot(h, whh_t_ref[...],
                     preferred_element_type=jnp.float32) + bhh            # (Bs, 3H)
        i_r, i_z, i_n = gi_t[:, 0:H], gi_t[:, H:2 * H], gi_t[:, 2 * H:3 * H]
        h_r, h_z, h_n = gh[:, 0:H], gh[:, H:2 * H], gh[:, 2 * H:3 * H]
        r = jax.nn.sigmoid(i_r + h_r)
        z = jax.nn.sigmoid(i_z + h_z)
        n = jnp.tanh(i_n + r * h_n)
        h = (1.0 - z) * n + z * h
        hseq_scr[t * Bs:(t + 1) * Bs, :] = h                              # full-vreg store
    hcarry_scr[...] = h
    hlast_ref[...] = h            # resident across the time axis; final block wins

    # --- Phase 3: fused head for this time block only (bounded VMEM, early writeback) ---
    h_all = hseq_scr[...]                                                 # (T_blk*Bs, H)
    y = (jnp.dot(h_all.astype(w1t_ref.dtype), w1t_ref[...],
                 preferred_element_type=jnp.float32) + b1_ref[...])
    y = jnp.maximum(y, 0.0)
    # Padded vocab lanes are masked via b2 (= -1e30 there, W2 columns zero): no iota/where.
    logits = (jnp.dot(y.astype(w2t_ref.dtype), w2t_ref[...],
                      preferred_element_type=jnp.float32) + b2_ref[...])
    m = jnp.max(logits, axis=-1, keepdims=True)
    s = logits - m
    lse = jnp.log(jnp.sum(jnp.exp(s), axis=-1, keepdims=True))
    out_ref[...] = (s - lse).reshape(T_blk, Bs, O)


# -----------------------------------------------------------------------------
# One-time parameter preparation: pad to (8,128)-friendly shapes, pre-transpose.
# Gate order (r, z, n) preserved; padding placed per gate block so math is exact.
# W_hh_T stays f32 (serial path); matmul_dtype applies only to throughput matmuls.
# -----------------------------------------------------------------------------
def prepare_params(params, matmul_dtype=jnp.float32):
    emb = params["embedding"]
    W_ih, W_hh = params["W_ih"], params["W_hh"]
    b_ih, b_hh = params["b_ih"], params["b_hh"]
    W1, b1 = params["W1"], params["b1"]
    W2, b2 = params["W2"], params["b2"]

    V, E = emb.shape
    H = W_hh.shape[1]
    O = W2.shape[0]
    E_pad, H_pad, O_pad = _round_up(E, 128), _round_up(H, 128), _round_up(O, 128)

    def pad2(a, shape):
        out = jnp.zeros(shape, jnp.float32)
        return out.at[:a.shape[0], :a.shape[1]].set(a.astype(jnp.float32))

    def pad_gates_T(W, in_dim, in_pad):              # (3H, in_dim) -> (in_pad, 3*H_pad)
        out = jnp.zeros((in_pad, 3 * H_pad), jnp.float32)
        for g in range(3):
            blk = W[g * H:(g + 1) * H, :].T          # (in_dim, H)
            out = out.at[:in_dim, g * H_pad:g * H_pad + H].set(blk)
        return out

    def pad_gate_bias(b):                            # (3H,) -> (1, 3*H_pad)
        out = jnp.zeros((1, 3 * H_pad), jnp.float32)
        for g in range(3):
            out = out.at[0, g * H_pad:g * H_pad + H].set(b[g * H:(g + 1) * H])
        return out

    # Fold vocab-pad masking into b2: padded lanes get -1e30 (W2 padded columns are 0).
    b2_pad = jnp.full((1, O_pad), -1e30, jnp.float32)
    b2_pad = b2_pad.at[0, :O].set(b2.astype(jnp.float32))

    return {
        "embedding": pad2(emb, (V, E_pad)).astype(matmul_dtype),
        "W_ih_T": pad_gates_T(W_ih, E, E_pad).astype(matmul_dtype),
        "W_hh_T": pad_gates_T(W_hh, H, H_pad),       # f32: serial recurrence path
        "b_ih": pad_gate_bias(b_ih),                 # biases stay f32 (added post-acc)
        "b_hh": pad_gate_bias(b_hh),
        "W1_T": pad2(W1.T, (H_pad, H_pad)).astype(matmul_dtype),
        "b1": pad2(b1.reshape(1, -1), (1, H_pad)),
        "W2_T": pad2(W2.T, (H_pad, O_pad)).astype(matmul_dtype),
        "b2": b2_pad,
    }


# -----------------------------------------------------------------------------
# Forward wrapper.
# -----------------------------------------------------------------------------
@functools.partial(jax.jit, static_argnames=("hidden_size", "output_size",
                                             "num_batch_shards", "time_block_target"))
def rnn_forward(tokens, prep, *, hidden_size, output_size,
                num_batch_shards=1, time_block_target=4):
    B, T = tokens.shape
    emb = prep["embedding"]                          # (V, E_pad), matmul dtype
    E_pad = emb.shape[1]
    H_pad = prep["W_hh_T"].shape[0]
    O_pad = prep["W2_T"].shape[1]

    # Don't shard the batch below 256 rows per shard (MXU M-starvation / serialized grid
    # steps on single-TC chips); at toy sizes this always resolves to 1 shard.
    shards = num_batch_shards
    if _round_up(B, 8 * shards) // shards < 256:
        shards = 1
    B_pad = _round_up(B, 8 * shards)
    Bs = B_pad // shards

    T_blk = _choose_time_block(T, time_block_target)
    n_tblk = T // T_blk

    # Embedding gather (time-major), padded batch rows use token 0 and are sliced away.
    tok_tm = jnp.pad(jnp.transpose(tokens, (1, 0)), ((0, 0), (0, B_pad - B)))
    x = jnp.take(emb, tok_tm, axis=0)                # (T, B_pad, E_pad)

    # Explicit scoped-VMEM budget: blocks (double-buffered) + weights (assume x2) +
    # scratch, with ~30% headroom; floor at the 32 MiB default, cap at physical 128 MiB.
    x_isz = jnp.dtype(emb.dtype).itemsize
    w_isz = jnp.dtype(prep["W_ih_T"].dtype).itemsize
    blk_bytes = 2 * (T_blk * Bs * E_pad * x_isz
                     + T_blk * Bs * O_pad * 4
                     + Bs * H_pad * 4)
    wt_bytes = 2 * (E_pad * 3 * H_pad * w_isz
                    + H_pad * 3 * H_pad * 4
                    + H_pad * H_pad * w_isz
                    + H_pad * O_pad * w_isz
                    + (2 * 3 * H_pad + H_pad + O_pad) * 4)
    scr_bytes = (T_blk * Bs * H_pad + Bs * H_pad + T_blk * Bs * 3 * H_pad) * 4
    vmem_limit = int((blk_bytes + wt_bytes + scr_bytes) * 1.3)
    vmem_limit = min(max(vmem_limit, 32 * 1024 * 1024), 128 * 1024 * 1024)

    out_tm, h_last = pl.pallas_call(
        rnn_fused_kernel,
        out_shape=(
            jax.ShapeDtypeStruct((T, B_pad, O_pad), jnp.float32),
            jax.ShapeDtypeStruct((B_pad, H_pad), jnp.float32),
        ),
        grid_spec=pltpu.PrefetchScalarGridSpec(
            num_scalar_prefetch=0,
            grid=(shards, n_tblk),                   # time innermost (carries hidden)
            in_specs=[
                pl.BlockSpec((T_blk, Bs, E_pad), lambda i, t: (t, i, 0)),
                pl.BlockSpec((E_pad, 3 * H_pad), lambda i, t: (0, 0)),
                pl.BlockSpec((H_pad, 3 * H_pad), lambda i, t: (0, 0)),
                pl.BlockSpec((1, 3 * H_pad), lambda i, t: (0, 0)),
                pl.BlockSpec((1, 3 * H_pad), lambda i, t: (0, 0)),
                pl.BlockSpec((H_pad, H_pad), lambda i, t: (0, 0)),
                pl.BlockSpec((1, H_pad), lambda i, t: (0, 0)),
                pl.BlockSpec((H_pad, O_pad), lambda i, t: (0, 0)),
                pl.BlockSpec((1, O_pad), lambda i, t: (0, 0)),
            ],
            out_specs=(
                pl.BlockSpec((T_blk, Bs, O_pad), lambda i, t: (t, i, 0)),
                pl.BlockSpec((Bs, H_pad), lambda i, t: (i, 0)),   # resident over time
            ),
            scratch_shapes=[
                pltpu.VMEM((T_blk * Bs, H_pad), jnp.float32),     # hseq (per block)
                pltpu.VMEM((Bs, H_pad), jnp.float32),             # h carry across blocks
            ],
        ),
        compiler_params=pltpu.CompilerParams(
            dimension_semantics=("parallel", "arbitrary"),
            vmem_limit_bytes=vmem_limit,
        ),
    )(x, prep["W_ih_T"], prep["W_hh_T"], prep["b_ih"], prep["b_hh"],
      prep["W1_T"], prep["b1"], prep["W2_T"], prep["b2"])

    output = jnp.transpose(out_tm, (1, 0, 2))[:B, :, :output_size]   # (B, T, O)
    hidden = h_last[None, :B, :hidden_size]                          # (1, B, H)
    return output, hidden


# -----------------------------------------------------------------------------
# Pure-JAX reference (torch nn.GRU semantics) for verification.
# -----------------------------------------------------------------------------
def rnn_reference(tokens, params):
    W_ih, W_hh = params["W_ih"], params["W_hh"]
    b_ih, b_hh = params["b_ih"], params["b_hh"]
    W1, b1 = params["W1"], params["b1"]
    W2, b2 = params["W2"], params["b2"]
    B, T = tokens.shape
    H = W_hh.shape[1]

    x = jnp.take(params["embedding"], tokens, axis=0)

    def step(h, x_t):
        gi = x_t @ W_ih.T + b_ih
        gh = h @ W_hh.T + b_hh
        i_r, i_z, i_n = jnp.split(gi, 3, axis=-1)
        h_r, h_z, h_n = jnp.split(gh, 3, axis=-1)
        r = jax.nn.sigmoid(i_r + h_r)
        z = jax.nn.sigmoid(i_z + h_z)
        n = jnp.tanh(i_n + r * h_n)
        h_new = (1.0 - z) * n + z * h
        return h_new, h_new

    h0 = jnp.zeros((B, H), jnp.float32)
    h_last, hs = lax.scan(step, h0, jnp.transpose(x, (1, 0, 2)))
    h_seq = jnp.transpose(hs, (1, 0, 2))
    y = jnp.maximum(h_seq @ W1.T + b1, 0.0)
    logits = y @ W2.T + b2
    return jax.nn.log_softmax(logits, axis=2), h_last[None]


def init_params(key, vocab, embed_dim, hidden, out_size):
    ks = jax.random.split(key, 9)
    k = 1.0 / jnp.sqrt(hidden)
    u = lambda kk, shape, s: jax.random.uniform(kk, shape, jnp.float32, -s, s)
    return {
        "embedding": jax.random.normal(ks[0], (vocab, embed_dim), jnp.float32),
        "W_ih": u(ks[1], (3 * hidden, embed_dim), k),
        "W_hh": u(ks[2], (3 * hidden, hidden), k),
        "b_ih": u(ks[3], (3 * hidden,), k),
        "b_hh": u(ks[4], (3 * hidden,), k),
        "W1": u(ks[5], (hidden, hidden), k),
        "b1": u(ks[6], (hidden,), k),
        "W2": u(ks[7], (out_size, hidden), k),
        "b2": u(ks[8], (out_size,), k),
    }


if __name__ == "__main__":
    # Small config: vocab=16, embed_dim=32, hidden=32, output=16, batch=2, seq=8.
    V, E, H, O = 16, 32, 32, 16
    B, T = 2, 8

    key = jax.random.PRNGKey(0)
    pkey, tkey = jax.random.split(key)
    params = init_params(pkey, V, E, H, O)
    tokens = jax.random.randint(tkey, (B, T), 0, V, dtype=jnp.int32)

    ref_out, ref_hidden = rnn_reference(tokens, params)

    # f32 path, 2 time blocks (exercises the cross-block hidden-state carry): exact.
    prep32 = prepare_params(params, matmul_dtype=jnp.float32)
    out32, hid32 = rnn_forward(tokens, prep32, hidden_size=H, output_size=O,
                               time_block_target=4)
    jax.block_until_ready((out32, hid32))
    assert out32.shape == (B, T, O) and hid32.shape == (1, B, H)
    assert jnp.allclose(out32, ref_out, rtol=1e-5, atol=1e-5)
    assert jnp.allclose(hid32, ref_hidden, rtol=1e-5, atol=1e-5)

    # f32 path, single time block: exact.
    out32b, hid32b = rnn_forward(tokens, prep32, hidden_size=H, output_size=O,
                                 time_block_target=8)
    jax.block_until_ready((out32b, hid32b))
    assert jnp.allclose(out32b, ref_out, rtol=1e-5, atol=1e-5)
    assert jnp.allclose(hid32b, ref_hidden, rtol=1e-5, atol=1e-5)

    # bf16 operands on throughput matmuls only; recurrence stays f32.
    prep16 = prepare_params(params, matmul_dtype=jnp.bfloat16)
    out16, hid16 = rnn_forward(tokens, prep16, hidden_size=H, output_size=O,
                               time_block_target=4)
    jax.block_until_ready((out16, hid16))
    assert jnp.allclose(out16, ref_out, atol=1e-1)
    assert jnp.allclose(hid16, ref_hidden, atol=1e-1)

    print("KERNEL_OK")
</pallas_src>

<mosaic_0001>
module attributes {stable_mosaic.version = 11 : i64} {
  func.func @rnn_fused_kernel(%arg0: i32, %arg1: i32, %arg2: memref<4x8x128xf32, #tpu.memory_space<vmem>>, %arg3: memref<128x384xf32, #tpu.memory_space<vmem>>, %arg4: memref<128x384xf32, #tpu.memory_space<vmem>>, %arg5: memref<1x384xf32, #tpu.memory_space<vmem>>, %arg6: memref<1x384xf32, #tpu.memory_space<vmem>>, %arg7: memref<128x128xf32, #tpu.memory_space<vmem>>, %arg8: memref<1x128xf32, #tpu.memory_space<vmem>>, %arg9: memref<128x128xf32, #tpu.memory_space<vmem>>, %arg10: memref<1x128xf32, #tpu.memory_space<vmem>>, %arg11: memref<4x8x128xf32, #tpu.memory_space<vmem>>, %arg12: memref<8x128xf32, #tpu.memory_space<vmem>>, %arg13: memref<32x128xf32, #tpu.memory_space<vmem>>, %arg14: memref<8x128xf32, #tpu.memory_space<vmem>>) attributes {dimension_semantics = [#tpu.dimension_semantics<parallel>, #tpu.dimension_semantics<arbitrary>], iteration_bounds = array<i64: 1, 2>, scalar_prefetch = 0 : i64, scratch_operands = 2 : i64, tpu.core_type = #tpu.core_type<tc>, window_params = [{transform_indices = @transform_0, window_bounds = array<i64: 4, 8, 128>}, {pipeline_mode = #tpu.pipeline_mode<synchronous>, transform_indices = @transform_1, window_bounds = array<i64: 128, 384>}, {pipeline_mode = #tpu.pipeline_mode<synchronous>, transform_indices = @transform_2, window_bounds = array<i64: 128, 384>}, {pipeline_mode = #tpu.pipeline_mode<synchronous>, transform_indices = @transform_3, window_bounds = array<i64: 1, 384>}, {pipeline_mode = #tpu.pipeline_mode<synchronous>, transform_indices = @transform_4, window_bounds = array<i64: 1, 384>}, {pipeline_mode = #tpu.pipeline_mode<synchronous>, transform_indices = @transform_5, window_bounds = array<i64: 128, 128>}, {pipeline_mode = #tpu.pipeline_mode<synchronous>, transform_indices = @transform_6, window_bounds = array<i64: 1, 128>}, {pipeline_mode = #tpu.pipeline_mode<synchronous>, transform_indices = @transform_7, window_bounds = array<i64: 128, 128>}, {pipeline_mode = #tpu.pipeline_mode<synchronous>, transform_indices = @transform_8, window_bounds = array<i64: 1, 128>}, {transform_indices = @transform_9, window_bounds = array<i64: 4, 8, 128>}, {transform_indices = @transform_10, window_bounds = array<i64: 8, 128>}]} {
    %c0_i32 = arith.constant 0 : i32
    %0 = arith.cmpi eq, %arg1, %c0_i32 : i32
    %1 = arith.extui %0 : i1 to i32
    %c0_i32_0 = arith.constant 0 : i32
    %2 = arith.cmpi ne, %1, %c0_i32_0 : i32
    scf.if %2 {
      %cst_62 = arith.constant 0.000000e+00 : f32
      %165 = vector.broadcast %cst_62 : f32 to vector<8x128xf32>
      %c0_63 = arith.constant 0 : index
      %c0_64 = arith.constant 0 : index
      %166 = vector.load %arg14[%c0_63, %c0_64] : memref<8x128xf32, #tpu.memory_space<vmem>>, vector<8x128xf32>
      tpu.vector_store %arg14[%c0_63, %c0_64], %165 {strides = array<i32>} : memref<8x128xf32, #tpu.memory_space<vmem>>, vector<8x128xf32>,
    } else {
    }
    %c0 = arith.constant 0 : index
    %c0_1 = arith.constant 0 : index
    %c0_2 = arith.constant 0 : index
    %3 = vector.load %arg2[%c0, %c0_1, %c0_2] : memref<4x8x128xf32, #tpu.memory_space<vmem>>, vector<4x8x128xf32>
    %4 = vector.shape_cast %3 : vector<4x8x128xf32> to vector<32x128xf32>
    %c0_3 = arith.constant 0 : index
    %c0_4 = arith.constant 0 : index
    %5 = vector.load %arg3[%c0_3, %c0_4] : memref<128x384xf32, #tpu.memory_space<vmem>>, vector<128x384xf32>
    %cst = arith.constant dense<0.000000e+00> : vector<32x384xf32>
    %6 = tpu.matmul %4, %5, %cst {dimension_numbers = #tpu.dot_dimension_numbers<[1], [0], [0], [1], [0, 0, 1, 1], [], []>} : vector<32x128xf32>, vector<128x384xf32>, vector<32x384xf32> -> vector<32x384xf32>
    %c0_5 = arith.constant 0 : index
    %c0_6 = arith.constant 0 : index
    %7 = vector.load %arg5[%c0_5, %c0_6] : memref<1x384xf32, #tpu.memory_space<vmem>>, vector<1x384xf32>
    %8 = vector.broadcast %7 : vector<1x384xf32> to vector<32x384xf32>
    %9 = arith.addf %6, %8 : vector<32x384xf32>
    %c0_7 = arith.constant 0 : index
    %c0_8 = arith.constant 0 : index
    %10 = vector.load %arg6[%c0_7, %c0_8] : memref<1x384xf32, #tpu.memory_space<vmem>>, vector<1x384xf32>
    %11 = vector.shape_cast %10 : vector<1x384xf32> to vector<1x384xf32>
    %12 = vector.broadcast %11 : vector<1x384xf32> to vector<8x384xf32>
    %c0_9 = arith.constant 0 : index
    %c0_10 = arith.constant 0 : index
    %13 = vector.load %arg14[%c0_9, %c0_10] : memref<8x128xf32, #tpu.memory_space<vmem>>, vector<8x128xf32>
    %14 = vector.extract_strided_slice %9 {offsets = [0, 0], sizes = [8, 384], strides = [1, 1]} : vector<32x384xf32> to vector<8x384xf32>
    %c0_11 = arith.constant 0 : index
    %c0_12 = arith.constant 0 : index
    %15 = vector.load %arg4[%c0_11, %c0_12] : memref<128x384xf32, #tpu.memory_space<vmem>>, vector<128x384xf32>
    %cst_13 = arith.constant dense<0.000000e+00> : vector<8x384xf32>
    %16 = tpu.matmul %13, %15, %cst_13 {dimension_numbers = #tpu.dot_dimension_numbers<[1], [0], [0], [1], [0, 0, 1, 1], [], []>} : vector<8x128xf32>, vector<128x384xf32>, vector<8x384xf32> -> vector<8x384xf32>
    %17 = arith.addf %16, %12 : vector<8x384xf32>
    %18 = vector.extract_strided_slice %14 {offsets = [0, 0], sizes = [8, 128], strides = [1, 1]} : vector<8x384xf32> to vector<8x128xf32>
    %19 = vector.extract_strided_slice %14 {offsets = [0, 128], sizes = [8, 128], strides = [1, 1]} : vector<8x384xf32> to vector<8x128xf32>
    %20 = vector.extract_strided_slice %14 {offsets = [0, 256], sizes = [8, 128], strides = [1, 1]} : vector<8x384xf32> to vector<8x128xf32>
    %21 = vector.extract_strided_slice %17 {offsets = [0, 0], sizes = [8, 128], strides = [1, 1]} : vector<8x384xf32> to vector<8x128xf32>
    %22 = vector.extract_strided_slice %17 {offsets = [0, 128], sizes = [8, 128], strides = [1, 1]} : vector<8x384xf32> to vector<8x128xf32>
    %23 = vector.extract_strided_slice %17 {offsets = [0, 256], sizes = [8, 128], strides = [1, 1]} : vector<8x384xf32> to vector<8x128xf32>
    %24 = arith.addf %18, %21 : vector<8x128xf32>
    %25 = arith.negf %24 : vector<8x128xf32>
    %26 = math.exp %25 : vector<8x128xf32>
    %cst_14 = arith.constant 1.000000e+00 : f32
    %27 = vector.broadcast %cst_14 : f32 to vector<8x128xf32>
    %28 = arith.addf %27, %26 : vector<8x128xf32>
    %29 = arith.divf %27, %28 : vector<8x128xf32>
    %30 = arith.addf %19, %22 : vector<8x128xf32>
    %31 = arith.negf %30 : vector<8x128xf32>
    %32 = math.exp %31 : vector<8x128xf32>
    %cst_15 = arith.constant 1.000000e+00 : f32
    %33 = vector.broadcast %cst_15 : f32 to vector<8x128xf32>
    %34 = arith.addf %33, %32 : vector<8x128xf32>
    %35 = arith.divf %33, %34 : vector<8x128xf32>
    %36 = arith.mulf %29, %23 : vector<8x128xf32>
    %37 = arith.addf %20, %36 : vector<8x128xf32>
    %38 = math.tanh %37 : vector<8x128xf32>
    %cst_16 = arith.constant 1.000000e+00 : f32
    %39 = vector.broadcast %cst_16 : f32 to vector<8x128xf32>
    %40 = arith.subf %39, %35 : vector<8x128xf32>
    %41 = arith.mulf %40, %38 : vector<8x128xf32>
    %42 = arith.mulf %35, %13 : vector<8x128xf32>
    %43 = arith.addf %41, %42 : vector<8x128xf32>
    %c0_17 = arith.constant 0 : index
    %c0_18 = arith.constant 0 : index
    %44 = vector.load %arg13[%c0_17, %c0_18] : memref<32x128xf32, #tpu.memory_space<vmem>>, vector<8x128xf32>
    tpu.vector_store %arg13[%c0_17, %c0_18], %43 {strides = array<i32>} : memref<32x128xf32, #tpu.memory_space<vmem>>, vector<8x128xf32>,
    %45 = vector.extract_strided_slice %9 {offsets = [8, 0], sizes = [8, 384], strides = [1, 1]} : vector<32x384xf32> to vector<8x384xf32>
    %c0_19 = arith.constant 0 : index
    %c0_20 = arith.constant 0 : index
    %46 = vector.load %arg4[%c0_19, %c0_20] : memref<128x384xf32, #tpu.memory_space<vmem>>, vector<128x384xf32>
    %cst_21 = arith.constant dense<0.000000e+00> : vector<8x384xf32>
    %47 = tpu.matmul %43, %46, %cst_21 {dimension_numbers = #tpu.dot_dimension_numbers<[1], [0], [0], [1], [0, 0, 1, 1], [], []>} : vector<8x128xf32>, vector<128x384xf32>, vector<8x384xf32> -> vector<8x384xf32>
    %48 = arith.addf %47, %12 : vector<8x384xf32>
    %49 = vector.extract_strided_slice %45 {offsets = [0, 0], sizes = [8, 128], strides = [1, 1]} : vector<8x384xf32> to vector<8x128xf32>
    %50 = vector.extract_strided_slice %45 {offsets = [0, 128], sizes = [8, 128], strides = [1, 1]} : vector<8x384xf32> to vector<8x128xf32>
    %51 = vector.extract_strided_slice %45 {offsets = [0, 256], sizes = [8, 128], strides = [1, 1]} : vector<8x384xf32> to vector<8x128xf32>
    %52 = vector.extract_strided_slice %48 {offsets = [0, 0], sizes = [8, 128], strides = [1, 1]} : vector<8x384xf32> to vector<8x128xf32>
    %53 = vector.extract_strided_slice %48 {offsets = [0, 128], sizes = [8, 128], strides = [1, 1]} : vector<8x384xf32> to vector<8x128xf32>
    %54 = vector.extract_strided_slice %48 {offsets = [0, 256], sizes = [8, 128], strides = [1, 1]} : vector<8x384xf32> to vector<8x128xf32>
    %55 = arith.addf %49, %52 : vector<8x128xf32>
    %56 = arith.negf %55 : vector<8x128xf32>
    %57 = math.exp %56 : vector<8x128xf32>
    %cst_22 = arith.constant 1.000000e+00 : f32
    %58 = vector.broadcast %cst_22 : f32 to vector<8x128xf32>
    %59 = arith.addf %58, %57 : vector<8x128xf32>
    %60 = arith.divf %58, %59 : vector<8x128xf32>
    %61 = arith.addf %50, %53 : vector<8x128xf32>
    %62 = arith.negf %61 : vector<8x128xf32>
    %63 = math.exp %62 : vector<8x128xf32>
    %cst_23 = arith.constant 1.000000e+00 : f32
    %64 = vector.broadcast %cst_23 : f32 to vector<8x128xf32>
    %65 = arith.addf %64, %63 : vector<8x128xf32>
    %66 = arith.divf %64, %65 : vector<8x128xf32>
    %67 = arith.mulf %60, %54 : vector<8x128xf32>
    %68 = arith.addf %51, %67 : vector<8x128xf32>
    %69 = math.tanh %68 : vector<8x128xf32>
    %cst_24 = arith.constant 1.000000e+00 : f32
    %70 = vector.broadcast %cst_24 : f32 to vector<8x128xf32>
    %71 = arith.subf %70, %66 : vector<8x128xf32>
    %72 = arith.mulf %71, %69 : vector<8x128xf32>
    %73 = arith.mulf %66, %43 : vector<8x128xf32>
    %74 = arith.addf %72, %73 : vector<8x128xf32>
    %c8 = arith.constant 8 : index
    %c0_25 = arith.constant 0 : index
    %75 = vector.load %arg13[%c8, %c0_25] : memref<32x128xf32, #tpu.memory_space<vmem>>, vector<8x128xf32>
    tpu.vector_store %arg13[%c8, %c0_25], %74 {strides = array<i32>} : memref<32x128xf32, #tpu.memory_space<vmem>>, vector<8x128xf32>,
    %76 = vector.extract_strided_slice %9 {offsets = [16, 0], sizes = [8, 384], strides = [1, 1]} : vector<32x384xf32> to vector<8x384xf32>
    %c0_26 = arith.constant 0 : index
    %c0_27 = arith.constant 0 : index
    %77 = vector.load %arg4[%c0_26, %c0_27] : memref<128x384xf32, #tpu.memory_space<vmem>>, vector<128x384xf32>
    %cst_28 = arith.constant dense<0.000000e+00> : vector<8x384xf32>
    %78 = tpu.matmul %74, %77, %cst_28 {dimension_numbers = #tpu.dot_dimension_numbers<[1], [0], [0], [1], [0, 0, 1, 1], [], []>} : vector<8x128xf32>, vector<128x384xf32>, vector<8x384xf32> -> vector<8x384xf32>
    %79 = arith.addf %78, %12 : vector<8x384xf32>
    %80 = vector.extract_strided_slice %76 {offsets = [0, 0], sizes = [8, 128], strides = [1, 1]} : vector<8x384xf32> to vector<8x128xf32>
    %81 = vector.extract_strided_slice %76 {offsets = [0, 128], sizes = [8, 128], strides = [1, 1]} : vector<8x384xf32> to vector<8x128xf32>
    %82 = vector.extract_strided_slice %76 {offsets = [0, 256], sizes = [8, 128], strides = [1, 1]} : vector<8x384xf32> to vector<8x128xf32>
    %83 = vector.extract_strided_slice %79 {offsets = [0, 0], sizes = [8, 128], strides = [1, 1]} : vector<8x384xf32> to vector<8x128xf32>
    %84 = vector.extract_strided_slice %79 {offsets = [0, 128], sizes = [8, 128], strides = [1, 1]} : vector<8x384xf32> to vector<8x128xf32>
    %85 = vector.extract_strided_slice %79 {offsets = [0, 256], sizes = [8, 128], strides = [1, 1]} : vector<8x384xf32> to vector<8x128xf32>
    %86 = arith.addf %80, %83 : vector<8x128xf32>
    %87 = arith.negf %86 : vector<8x128xf32>
    %88 = math.exp %87 : vector<8x128xf32>
    %cst_29 = arith.constant 1.000000e+00 : f32
    %89 = vector.broadcast %cst_29 : f32 to vector<8x128xf32>
    %90 = arith.addf %89, %88 : vector<8x128xf32>
    %91 = arith.divf %89, %90 : vector<8x128xf32>
    %92 = arith.addf %81, %84 : vector<8x128xf32>
    %93 = arith.negf %92 : vector<8x128xf32>
    %94 = math.exp %93 : vector<8x128xf32>
    %cst_30 = arith.constant 1.000000e+00 : f32
    %95 = vector.broadcast %cst_30 : f32 to vector<8x128xf32>
    %96 = arith.addf %95, %94 : vector<8x128xf32>
    %97 = arith.divf %95, %96 : vector<8x128xf32>
    %98 = arith.mulf %91, %85 : vector<8x128xf32>
    %99 = arith.addf %82, %98 : vector<8x128xf32>
    %100 = math.tanh %99 : vector<8x128xf32>
    %cst_31 = arith.constant 1.000000e+00 : f32
    %101 = vector.broadcast %cst_31 : f32 to vector<8x128xf32>
    %102 = arith.subf %101, %97 : vector<8x128xf32>
    %103 = arith.mulf %102, %100 : vector<8x128xf32>
    %104 = arith.mulf %97, %74 : vector<8x128xf32>
    %105 = arith.addf %103, %104 : vector<8x128xf32>
    %c16 = arith.constant 16 : index
    %c0_32 = arith.constant 0 : index
    %106 = vector.load %arg13[%c16, %c0_32] : memref<32x128xf32, #tpu.memory_space<vmem>>, vector<8x128xf32>
    tpu.vector_store %arg13[%c16, %c0_32], %105 {strides = array<i32>} : memref<32x128xf32, #tpu.memory_space<vmem>>, vector<8x128xf32>,
    %107 = vector.extract_strided_slice %9 {offsets = [24, 0], sizes = [8, 384], strides = [1, 1]} : vector<32x384xf32> to vector<8x384xf32>
    %c0_33 = arith.constant 0 : index
    %c0_34 = arith.constant 0 : index
    %108 = vector.load %arg4[%c0_33, %c0_34] : memref<128x384xf32, #tpu.memory_space<vmem>>, vector<128x384xf32>
    %cst_35 = arith.constant dense<0.000000e+00> : vector<8x384xf32>
    %109 = tpu.matmul %105, %108, %cst_35 {dimension_numbers = #tpu.dot_dimension_numbers<[1], [0], [0], [1], [0, 0, 1, 1], [], []>} : vector<8x128xf32>, vector<128x384xf32>, vector<8x384xf32> -> vector<8x384xf32>
    %110 = arith.addf %109, %12 : vector<8x384xf32>
    %111 = vector.extract_strided_slice %107 {offsets = [0, 0], sizes = [8, 128], strides = [1, 1]} : vector<8x384xf32> to vector<8x128xf32>
    %112 = vector.extract_strided_slice %107 {offsets = [0, 128], sizes = [8, 128], strides = [1, 1]} : vector<8x384xf32> to vector<8x128xf32>
    %113 = vector.extract_strided_slice %107 {offsets = [0, 256], sizes = [8, 128], strides = [1, 1]} : vector<8x384xf32> to vector<8x128xf32>
    %114 = vector.extract_strided_slice %110 {offsets = [0, 0], sizes = [8, 128], strides = [1, 1]} : vector<8x384xf32> to vector<8x128xf32>
    %115 = vector.extract_strided_slice %110 {offsets = [0, 128], sizes = [8, 128], strides = [1, 1]} : vector<8x384xf32> to vector<8x128xf32>
    %116 = vector.extract_strided_slice %110 {offsets = [0, 256], sizes = [8, 128], strides = [1, 1]} : vector<8x384xf32> to vector<8x128xf32>
    %117 = arith.addf %111, %114 : vector<8x128xf32>
    %118 = arith.negf %117 : vector<8x128xf32>
    %119 = math.exp %118 : vector<8x128xf32>
    %cst_36 = arith.constant 1.000000e+00 : f32
    %120 = vector.broadcast %cst_36 : f32 to vector<8x128xf32>
    %121 = arith.addf %120, %119 : vector<8x128xf32>
    %122 = arith.divf %120, %121 : vector<8x128xf32>
    %123 = arith.addf %112, %115 : vector<8x128xf32>
    %124 = arith.negf %123 : vector<8x128xf32>
    %125 = math.exp %124 : vector<8x128xf32>
    %cst_37 = arith.constant 1.000000e+00 : f32
    %126 = vector.broadcast %cst_37 : f32 to vector<8x128xf32>
    %127 = arith.addf %126, %125 : vector<8x128xf32>
    %128 = arith.divf %126, %127 : vector<8x128xf32>
    %129 = arith.mulf %122, %116 : vector<8x128xf32>
    %130 = arith.addf %113, %129 : vector<8x128xf32>
    %131 = math.tanh %130 : vector<8x128xf32>
    %cst_38 = arith.constant 1.000000e+00 : f32
    %132 = vector.broadcast %cst_38 : f32 to vector<8x128xf32>
    %133 = arith.subf %132, %128 : vector<8x128xf32>
    %134 = arith.mulf %133, %131 : vector<8x128xf32>
    %135 = arith.mulf %128, %105 : vector<8x128xf32>
    %136 = arith.addf %134, %135 : vector<8x128xf32>
    %c24 = arith.constant 24 : index
    %c0_39 = arith.constant 0 : index
    %137 = vector.load %arg13[%c24, %c0_39] : memref<32x128xf32, #tpu.memory_space<vmem>>, vector<8x128xf32>
    tpu.vector_store %arg13[%c24, %c0_39], %136 {strides = array<i32>} : memref<32x128xf32, #tpu.memory_space<vmem>>, vector<8x128xf32>,
    %c0_40 = arith.constant 0 : index
    %c0_41 = arith.constant 0 : index
    %138 = vector.load %arg14[%c0_40, %c0_41] : memref<8x128xf32, #tpu.memory_space<vmem>>, vector<8x128xf32>
    tpu.vector_store %arg14[%c0_40, %c0_41], %136 {strides = array<i32>} : memref<8x128xf32, #tpu.memory_space<vmem>>, vector<8x128xf32>,
    %c0_42 = arith.constant 0 : index
    %c0_43 = arith.constant 0 : index
    %139 = vector.load %arg12[%c0_42, %c0_43] : memref<8x128xf32, #tpu.memory_space<vmem>>, vector<8x128xf32>
    tpu.vector_store %arg12[%c0_42, %c0_43], %136 {strides = array<i32>} : memref<8x128xf32, #tpu.memory_space<vmem>>, vector<8x128xf32>,
    %c0_44 = arith.constant 0 : index
    %c0_45 = arith.constant 0 : index
    %140 = vector.load %arg13[%c0_44, %c0_45] : memref<32x128xf32, #tpu.memory_space<vmem>>, vector<32x128xf32>
    %c0_46 = arith.constant 0 : index
    %c0_47 = arith.constant 0 : index
    %141 = vector.load %arg7[%c0_46, %c0_47] : memref<128x128xf32, #tpu.memory_space<vmem>>, vector<128x128xf32>
    %cst_48 = arith.constant dense<0.000000e+00> : vector<32x128xf32>
    %142 = tpu.matmul %140, %141, %cst_48 {dimension_numbers = #tpu.dot_dimension_numbers<[1], [0], [0], [1], [0, 0, 1, 1], [], []>} : vector<32x128xf32>, vector<128x128xf32>, vector<32x128xf32> -> vector<32x128xf32>
    %c0_49 = arith.constant 0 : index
    %c0_50 = arith.constant 0 : index
    %143 = vector.load %arg8[%c0_49, %c0_50] : memref<1x128xf32, #tpu.memory_space<vmem>>, vector<1x128xf32>
    %144 = vector.broadcast %143 : vector<1x128xf32> to vector<32x128xf32>
    %145 = arith.addf %142, %144 : vector<32x128xf32>
    %cst_51 = arith.constant 0.000000e+00 : f32
    %146 = vector.broadcast %cst_51 : f32 to vector<32x128xf32>
    %147 = arith.maximumf %145, %146 : vector<32x128xf32>
    %c0_52 = arith.constant 0 : index
    %c0_53 = arith.constant 0 : index
    %148 = vector.load %arg9[%c0_52, %c0_53] : memref<128x128xf32, #tpu.memory_space<vmem>>, vector<128x128xf32>
    %cst_54 = arith.constant dense<0.000000e+00> : vector<32x128xf32>
    %149 = tpu.matmul %147, %148, %cst_54 {dimension_numbers = #tpu.dot_dimension_numbers<[1], [0], [0], [1], [0, 0, 1, 1], [], []>} : vector<32x128xf32>, vector<128x128xf32>, vector<32x128xf32> -> vector<32x128xf32>
    %c0_55 = arith.constant 0 : index
    %c0_56 = arith.constant 0 : index
    %150 = vector.load %arg10[%c0_55, %c0_56] : memref<1x128xf32, #tpu.memory_space<vmem>>, vector<1x128xf32>
    %151 = vector.broadcast %150 : vector<1x128xf32> to vector<32x128xf32>
    %152 = arith.addf %149, %151 : vector<32x128xf32>
    %cst_57 = arith.constant dense<0xFF800000> : vector<32xf32>
    %153 = vector.multi_reduction <maximumf>, %152, %cst_57 [1] : vector<32x128xf32> to vector<32xf32>
    %154 = vector.shape_cast %153 : vector<32xf32> to vector<32x1xf32>
    %155 = vector.broadcast %154 : vector<32x1xf32> to vector<32x128xf32>
    %156 = arith.subf %152, %155 : vector<32x128xf32>
    %157 = math.exp %156 : vector<32x128xf32>
    %cst_58 = arith.constant dense<0.000000e+00> : vector<32xf32>
    %158 = vector.multi_reduction <add>, %157, %cst_58 [1] : vector<32x128xf32> to vector<32xf32>
    %159 = vector.shape_cast %158 : vector<32xf32> to vector<32x1xf32>
    %160 = math.log %159 : vector<32x1xf32>
    %161 = vector.broadcast %160 : vector<32x1xf32> to vector<32x128xf32>
    %162 = arith.subf %156, %161 : vector<32x128xf32>
    %163 = vector.shape_cast %162 : vector<32x128xf32> to vector<4x8x128xf32>
    %c0_59 = arith.constant 0 : index
    %c0_60 = arith.constant 0 : index
    %c0_61 = arith.constant 0 : index
    %164 = vector.load %arg11[%c0_59, %c0_60, %c0_61] : memref<4x8x128xf32, #tpu.memory_space<vmem>>, vector<4x8x128xf32>
    tpu.vector_store %arg11[%c0_59, %c0_60, %c0_61], %163 {strides = array<i32>} : memref<4x8x128xf32, #tpu.memory_space<vmem>>, vector<4x8x128xf32>,
    return
  }
  func.func @transform_0(%arg0: i32, %arg1: i32) -> (i32, i32, i32) {
    %c0_i32 = arith.constant 0 : i32
    %c0_i32_0 = arith.constant 0 : i32
    return %arg1, %arg0, %c0_i32 : i32, i32, i32
  }
  func.func @transform_1(%arg0: i32, %arg1: i32) -> (i32, i32) {
    %c0_i32 = arith.constant 0 : i32
    %c0_i32_0 = arith.constant 0 : i32
    %c0_i32_1 = arith.constant 0 : i32
    return %c0_i32, %c0_i32_0 : i32, i32
  }
  func.func @transform_2(%arg0: i32, %arg1: i32) -> (i32, i32) {
    %c0_i32 = arith.constant 0 : i32
    %c0_i32_0 = arith.constant 0 : i32
    %c0_i32_1 = arith.constant 0 : i32
    return %c0_i32, %c0_i32_0 : i32, i32
  }
  func.func @transform_3(%arg0: i32, %arg1: i32) -> (i32, i32) {
    %c0_i32 = arith.constant 0 : i32
    %c0_i32_0 = arith.constant 0 : i32
    %c0_i32_1 = arith.constant 0 : i32
    return %c0_i32, %c0_i32_0 : i32, i32
  }
  func.func @transform_4(%arg0: i32, %arg1: i32) -> (i32, i32) {
    %c0_i32 = arith.constant 0 : i32
    %c0_i32_0 = arith.constant 0 : i32
    %c0_i32_1 = arith.constant 0 : i32
    return %c0_i32, %c0_i32_0 : i32, i32
  }
  func.func @transform_5(%arg0: i32, %arg1: i32) -> (i32, i32) {
    %c0_i32 = arith.constant 0 : i32
    %c0_i32_0 = arith.constant 0 : i32
    %c0_i32_1 = arith.constant 0 : i32
    return %c0_i32, %c0_i32_0 : i32, i32
  }
  func.func @transform_6(%arg0: i32, %arg1: i32) -> (i32, i32) {
    %c0_i32 = arith.constant 0 : i32
    %c0_i32_0 = arith.constant 0 : i32
    %c0_i32_1 = arith.constant 0 : i32
    return %c0_i32, %c0_i32_0 : i32, i32
  }
  func.func @transform_7(%arg0: i32, %arg1: i32) -> (i32, i32) {
    %c0_i32 = arith.constant 0 : i32
    %c0_i32_0 = arith.constant 0 : i32
    %c0_i32_1 = arith.constant 0 : i32
    return %c0_i32, %c0_i32_0 : i32, i32
  }
  func.func @transform_8(%arg0: i32, %arg1: i32) -> (i32, i32) {
    %c0_i32 = arith.constant 0 : i32
    %c0_i32_0 = arith.constant 0 : i32
    %c0_i32_1 = arith.constant 0 : i32
    return %c0_i32, %c0_i32_0 : i32, i32
  }
  func.func @transform_9(%arg0: i32, %arg1: i32) -> (i32, i32, i32) {
    %c0_i32 = arith.constant 0 : i32
    %c0_i32_0 = arith.constant 0 : i32
    return %arg1, %arg0, %c0_i32 : i32, i32, i32
  }
  func.func @transform_10(%arg0: i32, %arg1: i32) -> (i32, i32) {
    %c0_i32 = arith.constant 0 : i32
    %c0_i32_0 = arith.constant 0 : i32
    return %arg0, %c0_i32 : i32, i32
  }
}

</mosaic_0001>

<bundles_post_ra>
// kernel: rnn_forward.1
= control target key start
LH: loop header
LB: loop body
LE: loop exit
PB: predicated region body
PF: predicated region fallthrough
CT: control target
= control target key end

     0   :  { %16 = vsyncpa [#allocation5], 0  ;;  %s1713_s13 = smov 0   ;;  %s1715_s14 = smov 0   ;;  %s2354_s0 = inlined_call_operand.vmem [shape: f32[8,8,128], index: 0, kind: input, shape index: {}]   ;;  %s2355_s1 = inlined_call_operand.vmem [shape: f32[128,384], index: 1, kind: input, shape index: {}]   ;;  %s2356_s2 = inlined_call_operand.hbm [shape: f32[128,384], index: 2, kind: input, shape index: {}]   ;;  %s2357_s3 = inlined_call_operand.vmem [shape: f32[1,384], index: 3, kind: input, shape index: {}]   ;;  %s2358_s4 = inlined_call_operand.vmem [shape: f32[1,384], index: 4, kind: input, shape index: {}]   ;;  %s2359_s5 = inlined_call_operand.vmem [shape: f32[128,128], index: 5, kind: input, shape index: {}]   ;;  %s2360_s6 = inlined_call_operand.vmem [shape: f32[1,128], index: 6, kind: input, shape index: {}]   ;;  %s2361_s7 = inlined_call_operand.vmem [shape: f32[128,128], index: 7, kind: input, shape index: {}]   ;;  %s2362_s8 = inlined_call_operand.vmem [shape: f32[1,128], index: 8, kind: input, shape index: {}]   ;;  %s2363_s9 = inlined_call_operand.vmem [shape: f32[8,8,128], index: 9, kind: output, shape index: {0}]   ;;  %s2364_s10 = inlined_call_operand.vmem [shape: f32[8,128], index: 10, kind: output, shape index: {1}]  }
   0x1   :  { %s1717_s15 = smov 0  }
   0x2 LB: > { %s1477_s16 = sadd.s32 4294967295, %s1652_s15   ;;  %s31_s17 = sadd.s32 1, %s1648_s14  ;;  %s1652_s15 = sphi %s1717_s15, %s22_s15   ;;  %s1648_s14 = sphi %s1715_s14, %s2366_s14   ;;  %s1644_s13 = sphi %s1713_s13, %s2365_s13  }
   0x3   : > { %p32_p0 = scmp.ge.s32.totalorder %s31_s17, 2  ;;  %p1479_p1 = scmp.ge.s32.totalorder %s1652_s15, 1 }
   0x4   : > { %p289_p2 = scmp.lt.s32.totalorder %s1652_s15, 3  ;;  %p1508_p4 = scmp.eq.s32.totalorder %s1477_s16, 0 }
   0x5   : > { %s2368_s17 = smov (%p32_p0, %s31_s17), 0  ;;  %s303_s20 = sshll.u32 %s2356_s2, 4  ;;  %s304_s20 = int_to_ptr.hbm [resolvable:$true] %s303_s20 }
   0x6   : > { %p290_p3 = pnand %p1479_p1, %p289_p2  ;;  %s1654_s21 = smov [#allocation4]  }
   0x7   : > { %s305_s22 = sshll.u32 %s1654_s21, 4  ;;  %s1655_s23 = smov 384   ;;  %s306_s22 = int_to_ptr.vmem [resolvable:$true] %s305_s22 }
   0x8   : > { %p1504_p5 = pneg %p290_p3  ;;  %s1656_s24 = smov 24  }
   0x9   : > { %351 = sbr.rel (%p290_p3) target bundleno = 1307 (0x51b), region = 56 }
   0xa   : > { %p1505_p6 = pnand %p1508_p4, %p1504_p5 }
   0xc   : > { %1507 = dma.hbm_to_vmem [thread:$0]  (!%p1505_p6), %s304_s20, 6144, %s306_s22, [#allocation5], %s1655_s23, %s1655_s23, %s1656_s24  }
   0xe   : > { %1639 = dma.done.wait (%p1508_p4), [#allocation5], 6144  }
   0xf   : > { %1641 = vsyncadd (%p1508_p4), [#allocation5], 4294961152  ;;  %s1484_s25 = sshll.u32 %s1644_s13, 2  ;;  %p1488_p8 = scmp.ne.s32.totalorder %s1644_s13, 0 }
  0x10   : > { %p401_p7 = scmp.lt.s32.totalorder %s1484_s25, 7 }
  0x11   : > { %425 = sbr.rel (%p1488_p8) target bundleno = 24 (0x18), region = 64 }
  0x12   : > { %s2370_s25 = smov (!%p401_p7, %s1484_s25), 7 }
  0x13   : > { %s1485_s26 = sshll.u32 %s2370_s25, 3 }
  0x14   : > { %s1741_s29 = scalar_lea.vmem %s2354_s0, %s1485_s26  ;;  %s1746_s12 = scalar_lea.vmem %s2363_s9, %s1485_s26 }
  0x16   : > { %v1657_v0 = vmov 0.0  }
  0x17   : > { %426 = vst [vmem:[#allocation3] sm:$0xff] %v1657_v0 }
  0x18 PF: > { %v476_v1 = vld [vmem:[%s2355_s1 + $0x168] sm:$0xff]  ;;  %v1752_v2 = vld [vmem:[#allocation4 + $0x168] sm:$0xff]  ;;  %v1758_v4 = vld [vmem:[#allocation4 + $0x150] sm:$0xff] }
  0x19   : > { %v473_v3 = vld [vmem:[%s2355_s1 + $0x150] sm:$0xff]  ;;  %487 = vmatpush.msra.mxu1 %v476_v1  ;;  %631 = vmatpush.msra.mxu3 %v1752_v2  ;;  %v470_v5 = vld [vmem:[%s2355_s1 + $0x138] sm:$0xff]  ;;  %v1763_v6 = vld [vmem:[#allocation4 + $0x138] sm:$0xff] }
  0x1a   : > { %v467_v7 = vld [vmem:[%s2355_s1 + $0x120] sm:$0xff]  ;;  %v1769_v8 = vld [vmem:[#allocation4 + $0x120] sm:$0xff]  ;;  %v1775_v10 = vld [vmem:[#allocation4 + $0x108] sm:$0xff] }
  0x1b   : > { %488 = vmatpush.msra.mxu1 %v473_v3  ;;  %632 = vmatpush.msra.mxu3 %v1758_v4  ;;  %v464_v9 = vld [vmem:[%s2355_s1 + $0x108] sm:$0xff]  ;;  %v461_v11 = vld [vmem:[%s2355_s1 + $0xf0] sm:$0xff]  ;;  %v1781_v12 = vld [vmem:[#allocation4 + $0xf0] sm:$0xff] }
  0x1c   : > { %v458_v13 = vld [vmem:[%s2355_s1 + $0xd8] sm:$0xff]  ;;  %v1787_v14 = vld [vmem:[#allocation4 + $0xd8] sm:$0xff]  ;;  %v1795_v17 = vld [vmem:[#allocation4 + $0xc0] sm:$0xff] }
  0x1d   : > { %489 = vmatpush.msra.mxu1 %v470_v5  ;;  %633 = vmatpush.msra.mxu3 %v1763_v6  ;;  %v1790_v15 = vld [vmem:[#allocation4 + $0x170] sm:$0xff]  ;;  %v455_v16 = vld [vmem:[%s2355_s1 + $0xc0] sm:$0xff]  ;;  %v1801_v19 = vld [vmem:[#allocation4 + $0x140] sm:$0xff] }
  0x1e   : > { %651 = vmatpush.msra.mxu0 %v1790_v15  ;;  %v1798_v18 = vld [vmem:[#allocation4 + $0x158] sm:$0xff]  ;;  %v452_v20 = vld [vmem:[%s2355_s1 + $0xa8] sm:$0xff]  ;;  %v1806_v21 = vld [vmem:[#allocation4 + $0xa8] sm:$0xff] }
  0x1f   : > { %490 = vmatpush.msra.mxu1 %v467_v7  ;;  %634 = vmatpush.msra.mxu3 %v1769_v8  ;;  %v1810_v22 = vld [vmem:[#allocation4 + $0x128] sm:$0xff]  ;;  %v1815_v24 = vld [vmem:[#allocation4 + $0x90] sm:$0xff]  ;;  %v1824_v27 = vld [vmem:[#allocation4 + $0x78] sm:$0xff] }
  0x20   : > { %652 = vmatpush.msra.mxu0 %v1798_v18  ;;  %v449_v23 = vld [vmem:[%s2355_s1 + $0x90] sm:$0xff]  ;;  %v1819_v25 = vld [vmem:[#allocation4 + $0x110] sm:$0xff]  ;;  %v1828_v28 = vld [vmem:[#allocation4 + $0xf8] sm:$0xff] }
  0x21   : > { %491 = vmatpush.msra.mxu1 %v464_v9  ;;  %635 = vmatpush.msra.mxu3 %v1775_v10  ;;  %v446_v26 = vld [vmem:[%s2355_s1 + $0x78] sm:$0xff]  ;;  %v443_v29 = vld [vmem:[%s2355_s1 + $0x60] sm:$0xff]  ;;  %v1833_v30 = vld [vmem:[#allocation4 + $0x60] sm:$0xff] }
  0x22   : > { %653 = vmatpush.msra.mxu0 %v1801_v19  ;;  %v1837_v31 = vld [vmem:[#allocation4 + $0xe0] sm:$0xff]  ;;  %v1842_v33 = vld [vmem:[#allocation4 + $0x48] sm:$0xff]  ;;  %v1851_v36 = vld [vmem:[#allocation4 + $0x30] sm:$0xff] }
  0x23   : > { %492 = vmatpush.msra.mxu1 %v461_v11  ;;  %636 = vmatpush.msra.mxu3 %v1781_v12  ;;  %v440_v32 = vld [vmem:[%s2355_s1 + $0x48] sm:$0xff]  ;;  %v1846_v34 = vld [vmem:[#allocation4 + $0xc8] sm:$0xff]  ;;  %v1855_v37 = vld [vmem:[#allocation4 + $0xb0] sm:$0xff] }
  0x24   : > { %654 = vmatpush.msra.mxu0 %v1810_v22  ;;  %v437_v35 = vld [vmem:[%s2355_s1 + $0x30] sm:$0xff]  ;;  %v434_v38 = vld [vmem:[%s2355_s1 + $0x18] sm:$0xff]  ;;  %v1860_v39 = vld [vmem:[#allocation4 + $0x18] sm:$0xff] }
  0x25   : > { %493 = vmatpush.msra.mxu1 %v458_v13  ;;  %637 = vmatpush.msra.mxu3 %v1787_v14  ;;  %v1864_v40 = vld [vmem:[#allocation4 + $0x98] sm:$0xff]  ;;  %v1869_v42 = vld [vmem:[#allocation4] sm:$0xff]  ;;  %v478_v43 = vld [vmem:[%s2355_s1 + $0x178] sm:$0xff] }
  0x26   : > { %655 = vmatpush.msra.mxu0 %v1819_v25  ;;  %v431_v41 = vld [vmem:[%s2355_s1] sm:$0xff]  ;;  %v477_v46 = vld [vmem:[%s2355_s1 + $0x170] sm:$0xff]  ;;  %v1885_v47 = vld [vmem:[#allocation4 + $0x80] sm:$0xff]  ;;  %545 = vmatpush.msra.mxu2 %v478_v43 }
  0x27   : > { %494 = vmatpush.msra.mxu1 %v455_v16  ;;  %638 = vmatpush.msra.mxu3 %v1795_v17  ;;  %v1877_v44 = vld [vmem:[%s1741_s29] sm:$0xff]  ;;  %v474_v49 = vld [vmem:[%s2355_s1 + $0x158] sm:$0xff]  ;;  %v1896_v50 = vld [vmem:[#allocation4 + $0x68] sm:$0xff] }
  0x28   : > { %656 = vmatpush.msra.mxu0 %v1828_v28  ;;  %v1879_v45 = vld [vmem:[#allocation3] sm:$0xff]  ;;  %v472_v51 = vld [vmem:[%s2355_s1 + $0x148] sm:$0xff]  ;;  %v1905_v53 = vld [vmem:[#allocation4 + $0x50] sm:$0xff] }
  0x29   : > { %495 = vmatpush.msra.mxu1 %v452_v20  ;;  %639 = vmatpush.msra.mxu3 %v1806_v21  ;;  %v475_v48 = vld [vmem:[%s2355_s1 + $0x160] sm:$0xff]  ;;  %v469_v54 = vld [vmem:[%s2355_s1 + $0x130] sm:$0xff]  ;;  %v468_v55 = vld [vmem:[%s2355_s1 + $0x128] sm:$0xff] }
  0x2a   : > { %657 = vmatpush.msra.mxu0 %v1837_v31  ;;  %v471_v52 = vld [vmem:[%s2355_s1 + $0x140] sm:$0xff]  ;;  %546 = vmatpush.msra.mxu2 %v475_v48  ;;  %v1919_v57 = vld [vmem:[%s1741_s29 + $0x8] sm:$0xff]  ;;  %v466_v58 = vld [vmem:[%s2355_s1 + $0x118] sm:$0xff] }
  0x2b   : > { %496 = vmatpush.msra.mxu1 %v449_v23  ;;  %640 = vmatpush.msra.mxu3 %v1815_v24  ;;  %v1915_v56 = vld [vmem:[#allocation4 + $0x38] sm:$0xff]  ;;  %v465_v59 = vld [vmem:[%s2355_s1 + $0x110] sm:$0xff]  ;;  %v1928_v60 = vld [vmem:[#allocation4 + $0x20] sm:$0xff] }
  0x2c   : > { %658 = vmatpush.msra.mxu0 %v1846_v34  ;;  %547 = vmatpush.msra.mxu2 %v472_v51  ;;  %v463_v61 = vld [vmem:[%s2355_s1 + $0x100] sm:$0xff]  ;;  %v462_v62 = vld [vmem:[%s2355_s1 + $0xf8] sm:$0xff]  ;;  %v1939_v63 = vld [vmem:[#allocation4 + $0x8] sm:$0xff] }
  0x2d   : > { %497 = vmatpush.msra.mxu1 %v446_v26  ;;  %641 = vmatpush.msra.mxu3 %v1824_v27  ;;  %v460_v0 = vld [vmem:[%s2355_s1 + $0xe8] sm:$0xff]  ;;  %v459_v1 = vld [vmem:[%s2355_s1 + $0xe0] sm:$0xff]  ;;  %v457_v3 = vld [vmem:[%s2355_s1 + $0xd0] sm:$0xff] }
  0x2e   : > { %659 = vmatpush.msra.mxu0 %v1855_v37  ;;  %548 = vmatpush.msra.mxu2 %v469_v54  ;;  %v456_v5 = vld [vmem:[%s2355_s1 + $0xc8] sm:$0xff]  ;;  %v1957_v7 = vld [vmem:[#allocation4 + $0x178] sm:$0xff]  ;;  %v1960_v9 = vld [vmem:[%s1741_s29 + $0x10] sm:$0xff] }
  0x2f   : > { %498 = vmatpush.msra.mxu1 %v443_v29  ;;  %642 = vmatpush.msra.mxu3 %v1833_v30  ;;  %v454_v11 = vld [vmem:[%s2355_s1 + $0xb8] sm:$0xff]  ;;  %v453_v13 = vld [vmem:[%s2355_s1 + $0xb0] sm:$0xff]  ;;  %v1969_v16 = vld [vmem:[#allocation4 + $0x160] sm:$0xff] }
  0x30   : > { %660 = vmatpush.msra.mxu0 %v1864_v40  ;;  %549 = vmatpush.msra.mxu2 %v466_v58  ;;  %v451_v20 = vld [vmem:[%s2355_s1 + $0xa0] sm:$0xff]  ;;  %v450_v23 = vld [vmem:[%s2355_s1 + $0x98] sm:$0xff]  ;;  %v1980_v26 = vld [vmem:[#allocation4 + $0x148] sm:$0xff] }
  0x31   : > { %499 = vmatpush.msra.mxu1 %v440_v32  ;;  %643 = vmatpush.msra.mxu3 %v1842_v33  ;;  %v448_v29 = vld [vmem:[%s2355_s1 + $0x88] sm:$0xff]  ;;  %v447_v32 = vld [vmem:[%s2355_s1 + $0x80] sm:$0xff]  ;;  %v442_v48 = vld [vmem:[%s2355_s1 + $0x58] sm:$0xff] }
  0x32   : > { %661 = vmatpush.msra.mxu0 %v1885_v47  ;;  %550 = vmatpush.msra.mxu2 %v463_v61  ;;  %v1999_v43 = vld [vmem:[#allocation4 + $0x118] sm:$0xff]  ;;  %v2012_v51 = vld [vmem:[#allocation4 + $0x100] sm:$0xff]  ;;  %v438_v54 = vld [vmem:[%s2355_s1 + $0x38] sm:$0xff] }
  0x33   : > { %500 = vmatpush.msra.mxu1 %v437_v35  ;;  %644 = vmatpush.msra.mxu3 %v1851_v36  ;;  %v1989_v35 = vld [vmem:[#allocation4 + $0x130] sm:$0xff]  ;;  %v436_v58 = vld [vmem:[%s2355_s1 + $0x28] sm:$0xff] }
  0x34   : > { %662 = vmatpush.msra.mxu0 %v1896_v50  ;;  %551 = vmatpush.msra.mxu2 %v460_v0  ;;  %v2032_v61 = vld [vmem:[#allocation4 + $0xd0] sm:$0xff]  ;;  %v432_v0 = vld [vmem:[%s2355_s1 + $0x8] sm:$0xff] }
  0x35   : > { %501 = vmatpush.msra.mxu1 %v434_v38  ;;  %645 = vmatpush.msra.mxu3 %v1860_v39  ;;  %v445_v38 = vld [vmem:[%s2355_s1 + $0x70] sm:$0xff] }
  0x36   : > { %663 = vmatpush.msra.mxu0 %v1905_v53  ;;  %552 = vmatpush.msra.mxu2 %v457_v3  ;;  %v2049_v3 = vld [vmem:[#allocation4 + $0xa0] sm:$0xff] }
  0x37   : > { %502 = vmatpush.msra.mxu1 %v431_v41  ;;  %646 = vmatpush.msra.mxu3 %v1869_v42  ;;  %v444_v41 = vld [vmem:[%s2355_s1 + $0x68] sm:$0xff] }
  0x38   : > { %503 = vmatmul.f32.vlgmr.msra.gmra.mxu1 %v1877_v44  ;;  %647 = vmatmul.f32.vlgmr.msra.gmra.mxu3 %v1879_v45 }
  0x39   : > { %516 = vmatpush.msrb.mxu1 %v477_v46  ;;  %807 = vmatpush.msrb.mxu3 %v1790_v15  ;;  %v2003_v46 = vld [vmem:[%s1741_s29 + $0x18] sm:$0xff] }
  0x3a   : > { %664 = vmatpush.msra.mxu0 %v1915_v56  ;;  %553 = vmatpush.msra.mxu2 %v454_v11  ;;  %v2060_v11 = vld [vmem:[#allocation4 + $0x70] sm:$0xff] }
  0x3b   : > { %517 = vmatpush.msrb.mxu1 %v474_v49  ;;  %808 = vmatpush.msrb.mxu3 %v1798_v18  ;;  %v441_v49 = vld [vmem:[%s2355_s1 + $0x50] sm:$0xff] }
  0x3c   : > { %665 = vmatpush.msra.mxu0 %v1928_v60  ;;  %554 = vmatpush.msra.mxu2 %v451_v20  ;;  %v588_v20 = vld [vmem:[#allocation4 + $0x28] sm:$0xff] }
  0x3d   : > { %518 = vmatpush.msrb.mxu1 %v471_v52  ;;  %809 = vmatpush.msrb.mxu3 %v1801_v19  ;;  %v439_v52 = vld [vmem:[%s2355_s1 + $0x40] sm:$0xff] }
  0x3e   : > { %666 = vmatpush.msra.mxu0 %v1939_v63  ;;  %555 = vmatpush.msra.mxu2 %v448_v29 }
  0x3f   : > { %519 = vmatpush.msrb.mxu1 %v468_v55  ;;  %810 = vmatpush.msrb.mxu3 %v1810_v22  ;;  %v2023_v55 = vld [vmem:[#allocation4 + $0xe8] sm:$0xff] }
  0x40   : > { %506 = vmatmul.f32.gmra.mxu1 %v1919_v57  ;;  %667 = vmatmul.f32.vlgmr.msra.gmra.mxu0 %v1879_v45 }
  0x41   : > { %520 = vmatpush.msrb.mxu1 %v465_v59  ;;  %827 = vmatpush.msrb.mxu0 %v1957_v7  ;;  %v435_v59 = vld [vmem:[%s2355_s1 + $0x20] sm:$0xff] }
  0x42   : > { %811 = vmatpush.msrb.mxu3 %v1819_v25  ;;  %556 = vmatpush.msra.mxu2 %v445_v38 }
  0x43   : > { %521 = vmatpush.msrb.mxu1 %v462_v62  ;;  %828 = vmatpush.msrb.mxu0 %v1969_v16  ;;  %v433_v62 = vld [vmem:[%s2355_s1 + $0x10] sm:$0xff] }
  0x44   : > { %812 = vmatpush.msrb.mxu3 %v1828_v28  ;;  %557 = vmatpush.msra.mxu2 %v442_v48 }
  0x45   : > { %522 = vmatpush.msrb.mxu1 %v459_v1  ;;  %829 = vmatpush.msrb.mxu0 %v1980_v26  ;;  %v2042_v1 = vld [vmem:[#allocation4 + $0xb8] sm:$0xff] }
  0x46   : > { %813 = vmatpush.msrb.mxu3 %v1837_v31  ;;  %558 = vmatpush.msra.mxu2 %v439_v52 }
  0x47   : > { %523 = vmatpush.msrb.mxu1 %v456_v5  ;;  %830 = vmatpush.msrb.mxu0 %v1989_v35  ;;  %v2054_v5 = vld [vmem:[#allocation4 + $0x88] sm:$0xff] }
  0x48   : > { %509 = vmatmul.f32.gmra.mxu1 %v1960_v9  ;;  %814 = vmatpush.msrb.mxu3 %v1846_v34 }
  0x49   : > { %524 = vmatpush.msrb.mxu1 %v453_v13  ;;  %831 = vmatpush.msrb.mxu0 %v1999_v43  ;;  %v591_v13 = vld [vmem:[#allocation4 + $0x40] sm:$0xff] }
  0x4a   : > { %815 = vmatpush.msrb.mxu3 %v1855_v37  ;;  %559 = vmatpush.msra.mxu2 %v436_v58 }
  0x4b   : > { %525 = vmatpush.msrb.mxu1 %v450_v23  ;;  %832 = vmatpush.msrb.mxu0 %v2012_v51 }
  0x4c   : > { %816 = vmatpush.msrb.mxu3 %v1864_v40  ;;  %560 = vmatpush.msra.mxu2 %v433_v62 }
  0x4d   : > { %526 = vmatpush.msrb.mxu1 %v447_v32  ;;  %833 = vmatpush.msrb.mxu0 %v2023_v55 }
  0x4e   : > { %817 = vmatpush.msrb.mxu3 %v1885_v47  ;;  %561 = vmatmul.f32.vlgmr.msra.gmra.mxu2 %v1877_v44 }
  0x4f   : > { %527 = vmatpush.msrb.mxu1 %v444_v41  ;;  %834 = vmatpush.msrb.mxu0 %v2032_v61 }
  0x50   : > { %512 = vmatmul.f32.gmra.mxu1 %v2003_v46  ;;  %787 = vmatpush.msrb.mxu2 %v1752_v2 }
  0x51   : > { %528 = vmatpush.msrb.mxu1 %v441_v49  ;;  %835 = vmatpush.msrb.mxu0 %v2042_v1 }
  0x52   : > { %788 = vmatpush.msrb.mxu2 %v1758_v4  ;;  %818 = vmatpush.msrb.mxu3 %v1896_v50 }
  0x53   : > { %529 = vmatpush.msrb.mxu1 %v438_v54  ;;  %836 = vmatpush.msrb.mxu0 %v2049_v3 }
  0x54   : > { %789 = vmatpush.msrb.mxu2 %v1763_v6  ;;  %819 = vmatpush.msrb.mxu3 %v1905_v53 }
  0x55   : > { %530 = vmatpush.msrb.mxu1 %v435_v59  ;;  %837 = vmatpush.msrb.mxu0 %v2054_v5 }
  0x56   : > { %790 = vmatpush.msrb.mxu2 %v1769_v8  ;;  %820 = vmatpush.msrb.mxu3 %v1915_v56 }
  0x57   : > { %531 = vmatpush.msrb.mxu1 %v432_v0  ;;  %838 = vmatpush.msrb.mxu0 %v2060_v11 }
  0x58   : > { %532 = vmatmul.f32.vlgmr.msrb.gmra.mxu1 %v1877_v44  ;;  %564 = vmatmul.f32.gmra.mxu2 %v1919_v57  ;;  %v594_v44 = vld [vmem:[#allocation4 + $0x58] sm:$0xff] }
  0x59   : > { %671 = vmatpush.msra.mxu1 %v1957_v7  ;;  %791 = vmatpush.msrb.mxu2 %v1775_v10 }
  0x5a   : > { %839 = vmatpush.msrb.mxu0 %v594_v44  ;;  %821 = vmatpush.msrb.mxu3 %v1928_v60 }
  0x5b   : > { %672 = vmatpush.msra.mxu1 %v1969_v16  ;;  %792 = vmatpush.msrb.mxu2 %v1781_v12 }
  0x5c   : > { %840 = vmatpush.msrb.mxu0 %v591_v13  ;;  %822 = vmatpush.msrb.mxu3 %v1939_v63 }
  0x5d   : > { %673 = vmatpush.msra.mxu1 %v1980_v26  ;;  %793 = vmatpush.msrb.mxu2 %v1787_v14 }
  0x5e   : > { %841 = vmatpush.msrb.mxu0 %v588_v20  ;;  %983 = vmatpush.msra.mxu3 %v1957_v7 }
  0x5f   : > { %674 = vmatpush.msra.mxu1 %v1989_v35  ;;  %794 = vmatpush.msrb.mxu2 %v1795_v17 }
  0x60   : > { %535 = vmatmul.f32.gmra.mxu1 %v1919_v57  ;;  %567 = vmatmul.f32.gmra.mxu2 %v1960_v9  ;;  %v585_v57 = vld [vmem:[#allocation4 + $0x10] sm:$0xff] }
  0x61   : > { %675 = vmatpush.msra.mxu1 %v1999_v43  ;;  %795 = vmatpush.msrb.mxu2 %v1806_v21 }
  0x62   : > { %842 = vmatpush.msrb.mxu0 %v585_v57  ;;  %984 = vmatpush.msra.mxu3 %v1969_v16 }
  0x63   : > { %676 = vmatpush.msra.mxu1 %v2012_v51  ;;  %796 = vmatpush.msrb.mxu2 %v1815_v24 }
  0x64   : > { %985 = vmatpush.msra.mxu3 %v1980_v26 }
  0x65   : > { %677 = vmatpush.msra.mxu1 %v2023_v55  ;;  %797 = vmatpush.msrb.mxu2 %v1824_v27 }
  0x66   : > { %986 = vmatpush.msra.mxu3 %v1989_v35 }
  0x67   : > { %678 = vmatpush.msra.mxu1 %v2032_v61  ;;  %798 = vmatpush.msrb.mxu2 %v1833_v30 }
  0x68   : > { %538 = vmatmul.f32.gmra.mxu1 %v1960_v9  ;;  %570 = vmatmul.f32.gmra.mxu2 %v2003_v46 }
  0x69   : > { %679 = vmatpush.msra.mxu1 %v2042_v1  ;;  %799 = vmatpush.msrb.mxu2 %v1842_v33 }
  0x6a   : > { %987 = vmatpush.msra.mxu3 %v1999_v43 }
  0x6b   : > { %680 = vmatpush.msra.mxu1 %v2049_v3  ;;  %800 = vmatpush.msrb.mxu2 %v1851_v36 }
  0x6c   : > { %988 = vmatpush.msra.mxu3 %v2012_v51 }
  0x6d   : > { %681 = vmatpush.msra.mxu1 %v2054_v5  ;;  %801 = vmatpush.msrb.mxu2 %v1860_v39 }
  0x6e   : > { %989 = vmatpush.msra.mxu3 %v2023_v55 }
  0x6f   : > { %682 = vmatpush.msra.mxu1 %v2060_v11  ;;  %802 = vmatpush.msrb.mxu2 %v1869_v42 }
  0x70   : > { %541 = vmatmul.f32.gmra.mxu1 %v2003_v46  ;;  %990 = vmatpush.msra.mxu3 %v2032_v61 }
  0x71   : > { %683 = vmatpush.msra.mxu1 %v594_v44  ;;  %963 = vmatpush.msra.mxu2 %v1790_v15 }
  0x72   : > { %991 = vmatpush.msra.mxu3 %v2042_v1 }
  0x73   : > { %684 = vmatpush.msra.mxu1 %v591_v13  ;;  %964 = vmatpush.msra.mxu2 %v1798_v18 }
  0x74   : > { %992 = vmatpush.msra.mxu3 %v2049_v3 }
  0x75   : > { %685 = vmatpush.msra.mxu1 %v588_v20  ;;  %965 = vmatpush.msra.mxu2 %v1801_v19 }
  0x76   : > { %993 = vmatpush.msra.mxu3 %v2054_v5 }
  0x77   : > { %686 = vmatpush.msra.mxu1 %v585_v57  ;;  %966 = vmatpush.msra.mxu2 %v1810_v22 }
  0x78   : > { %687 = vmatmul.f32.vlgmr.msra.gmra.mxu1 %v1879_v45  ;;  %994 = vmatpush.msra.mxu3 %v2060_v11 }
  0x79   : > { %943 = vmatpush.msrb.mxu1 %v1752_v2  ;;  %967 = vmatpush.msra.mxu2 %v1819_v25 }
  0x7a   : > { %995 = vmatpush.msra.mxu3 %v594_v44 }
  0x7b   : > { %944 = vmatpush.msrb.mxu1 %v1758_v4  ;;  %968 = vmatpush.msra.mxu2 %v1828_v28  ;;  %v479_v4 = vld [vmem:[%s2357_s3] sm:$0x7] }
  0x7c   : > { %996 = vmatpush.msra.mxu3 %v591_v13  ;;  %v2168_v51 = vperm.slane %v479_v4, 2 }
  0x7d   : > { %945 = vmatpush.msrb.mxu1 %v1763_v6  ;;  %969 = vmatpush.msra.mxu2 %v1837_v31  ;;  %v574_v6 = vld [vmem:[%s2358_s4] sm:$0x7]  ;;  %v482_v31 = vperm.slane %v479_v4, 1 }
  0x7e   : > { %997 = vmatpush.msra.mxu3 %v588_v20  ;;  %v2157_v28 = vperm.slane %v574_v6, 1  ;;  %v2173_v59 = vperm.slane %v574_v6, 2 }
  0x7f   : > { %946 = vmatpush.msrb.mxu1 %v1769_v8  ;;  %970 = vmatpush.msra.mxu2 %v1846_v34  ;;  %v481_v8 = vperm.slane %v479_v4, 0 }
  0x80   : > { %998 = vmatpush.msra.mxu3 %v585_v57 }
  0x81   : > { %947 = vmatpush.msrb.mxu1 %v1775_v10  ;;  %971 = vmatpush.msra.mxu2 %v1855_v37 }
  0x83   : > { %948 = vmatpush.msrb.mxu1 %v1781_v12  ;;  %972 = vmatpush.msra.mxu2 %v1864_v40  ;;  %v2148_v12 = vperm.slane %v574_v6, 0 }
  0x85   : > { %949 = vmatpush.msrb.mxu1 %v1787_v14  ;;  %973 = vmatpush.msra.mxu2 %v1885_v47 }
  0x87   : > { %950 = vmatpush.msrb.mxu1 %v1795_v17  ;;  %974 = vmatpush.msra.mxu2 %v1896_v50 }
  0x89   : > { %951 = vmatpush.msrb.mxu1 %v1806_v21  ;;  %975 = vmatpush.msra.mxu2 %v1905_v53 }
  0x8b   : > { %952 = vmatpush.msrb.mxu1 %v1815_v24  ;;  %976 = vmatpush.msra.mxu2 %v1915_v56 }
  0x8d   : > { %953 = vmatpush.msrb.mxu1 %v1824_v27  ;;  %977 = vmatpush.msra.mxu2 %v1928_v60 }
  0x8f   : > { %954 = vmatpush.msrb.mxu1 %v1833_v30  ;;  %978 = vmatpush.msra.mxu2 %v1939_v63 }
  0x91   : > { %955 = vmatpush.msrb.mxu1 %v1842_v33 }
  0x93   : > { %956 = vmatpush.msrb.mxu1 %v1851_v36 }
  0x95   : > { %957 = vmatpush.msrb.mxu1 %v1860_v39 }
  0x97   : > { %958 = vmatpush.msrb.mxu1 %v1869_v42 }
  0xb5   : > { %v504_v2 = vpop.f32.mrf.mxu1 }
  0xb6   : > { %v505_v18 = vadd.f32 %v504_v2, %v481_v8 }
  0xbb   : > { %v648_v15 = vpop.f32.mrf.mxu3 }
  0xbc   : > { %v649_v17 = vadd.f32 %v648_v15, %v2148_v12 }
  0xbd   : > { %v507_v10 = vpop.f32.mrf.mxu1  ;;  %v668_v30 = vpop.f32.mrf.mxu0 }
  0xbe   : > { %v2150_v14 = vadd.f32 %v507_v10, %v481_v8  ;;  %v691_v21 = vadd.f32 %v649_v17, %v505_v18  ;;  %v669_v34 = vadd.f32 %v668_v30, %v2157_v28 }
  0xc0   : > { %v1489_v24 = vmul.f32 -1.442695, %v691_v21 }
  0xc2   : > { %1540 = vpow2.f32 %v1489_v24 }
  0xc5   : > { %v510_v19 = vpop.f32.mrf.mxu1 }
  0xc6   : > { %v2153_v22 = vadd.f32 %v510_v19, %v481_v8 }
  0xc8   : > { %v1541_v33 = vpop.eup %1540 }
  0xc9   : > { %v695_v39 = vadd.f32 1.0, %v1541_v33 }
  0xcb   : > { %1542 = vrcp.f32 %v695_v39  ;;  %v707_v55 = vand.u32 2147483648, %v695_v39  ;;  %vm701_vm1 = vweird.f32 %v695_v39  ;;  %v705_v61 = vand.u32 2147483647, %v695_v39 }
  0xcd   : > { %v513_v25 = vpop.f32.mrf.mxu1  ;;  %v708_v3 = vor.u32 1.1754944e-38, %v707_v55  ;;  %vm706_vm3 = vcmp.eq.f32.partialorder %v705_v61, 8.507059e+37 }
  0xce   : > { %v2155_v27 = vadd.f32 %v513_v25, %v481_v8  ;;  %v1227_v25 = vld [vmem:[%s2359_s5 + $0x70] sm:$0xff] }
  0xd1   : > { %v562_v53 = vpop.f32.mrf.mxu2  ;;  %v1543_v56 = vpop.eup %1542 }
  0xd2   : > { %v697_v9 = vmul.f32 %v1543_v56, %v695_v39  ;;  %vm702_vm0 = vweird.f32 %v1543_v56  ;;  %v563_v11 = vadd.f32 %v562_v53, %v2168_v51  ;;  %v1221_v53 = vld [vmem:[%s2359_s5 + $0x40] sm:$0xff] }
  0xd3   : > { %vm703_vm2 = vmor %vm701_vm1, %vm702_vm0 }
  0xd4   : > { %v698_v32 = vsub.f32 1.0, %v697_v9 }
  0xd5   : > { %v533_v36 = vpop.f32.mrf.mxu1 }
  0xd6   : > { %v534_v37 = vadd.f32 %v533_v36, %v482_v31  ;;  %v699_v43 = vmul.f32 %v1543_v56, %v698_v32  ;;  %v1223_v36 = vld [vmem:[%s2359_s5 + $0x50] sm:$0xff] }
  0xd8   : > { %v711_v40 = vadd.f32 %v669_v34, %v534_v37  ;;  %v700_v52 = vadd.f32 %v1543_v56, %v699_v43  ;;  %v1224_v34 = vld [vmem:[%s2359_s5 + $0x58] sm:$0xff]  ;;  %v1214_v43 = vld [vmem:[%s2359_s5 + $0x8] sm:$0xff] }
  0xda   : > { %v1490_v42 = vmul.f32 -1.442695, %v711_v40  ;;  %v704_v0 = vsel %vm703_vm2, %v1543_v56, %v700_v52  ;;  %v1222_v40 = vld [vmem:[%s2359_s5 + $0x48] sm:$0xff]  ;;  %v1220_v56 = vld [vmem:[%s2359_s5 + $0x38] sm:$0xff] }
  0xdb   : > { %v2164_v35 = vpop.f32.mrf.mxu2  ;;  %v709_v44 = vsel %vm706_vm3, %v708_v3, %v704_v0 }
  0xdc   : > { %1544 = vpow2.f32 %v1490_v42 }
  0xdd   : > { %v536_v47 = vpop.f32.mrf.mxu1 }
  0xde   : > { %v2160_v50 = vadd.f32 %v536_v47, %v482_v31 }
  0xe2   : > { %v1545_v60 = vpop.eup %1544 }
  0xe3   : > { %v715_v63 = vadd.f32 1.0, %v1545_v60  ;;  %v568_v54 = vpop.f32.mrf.mxu2 }
  0xe4   : > { %v2171_v58 = vadd.f32 %v568_v54, %v2168_v51 }
  0xe5   : > { %1546 = vrcp.f32 %v715_v63  ;;  %v539_v23 = vpop.f32.mrf.mxu1  ;;  %v727_v20 = vand.u32 2147483648, %v715_v63  ;;  %vm721_vm5 = vweird.f32 %v715_v63  ;;  %v725_v2 = vand.u32 2147483647, %v715_v63 }
  0xe6   : > { %v2162_v29 = vadd.f32 %v539_v23, %v482_v31 }
  0xe7   : > { %v728_v8 = vor.u32 1.1754944e-38, %v727_v20  ;;  %vm726_vm7 = vcmp.eq.f32.partialorder %v725_v2, 8.507059e+37 }
  0xeb   : > { %v1547_v38 = vpop.eup %1546  ;;  %v2186_v24 = vpop.f32.mrf.mxu2 }
  0xec   : > { %v717_v41 = vmul.f32 %v1547_v38, %v715_v63  ;;  %vm722_vm4 = vweird.f32 %v1547_v38  ;;  %v1217_v63 = vld [vmem:[%s2359_s5 + $0x20] sm:$0xff] }
  0xed   : > { %v542_v46 = vpop.f32.mrf.mxu1  ;;  %vm723_vm6 = vmor %vm721_vm5, %vm722_vm4 }
  0xee   : > { %v2166_v48 = vadd.f32 %v542_v46, %v482_v31  ;;  %v718_v49 = vsub.f32 1.0, %v717_v41  ;;  %v1215_v41 = vld [vmem:[%s2359_s5 + $0x10] sm:$0xff]  ;;  %v1213_v46 = vld [vmem:[%s2359_s5] sm:$0xff] }
  0xf0   : > { %v719_v62 = vmul.f32 %v1547_v38, %v718_v49 }
  0xf2   : > { %v720_v13 = vadd.f32 %v1547_v38, %v719_v62 }
  0xf4   : > { %v724_v6 = vsel %vm723_vm6, %v1547_v38, %v720_v13  ;;  %v1216_v38 = vld [vmem:[%s2359_s5 + $0x18] sm:$0xff] }
  0xf5   : > { %v688_v1 = vpop.f32.mrf.mxu1  ;;  %v729_v10 = vsel %vm726_vm7, %v728_v8, %v724_v6  ;;  %v566_v6 = vadd.f32 %v2164_v35, %v2168_v51 }
  0xf6   : > { %v689_v5 = vadd.f32 %v688_v1, %v2173_v59  ;;  %v734_v15 = vsub.f32 1.0, %v729_v10  ;;  %v736_v19 = vmul.f32 %v729_v10, %v1879_v45  ;;  %v1228_v45 = vld [vmem:[%s2359_s5 + $0x78] sm:$0xff] }
  0xf8   : > { %v731_v57 = vmul.f32 %v709_v44, %v689_v5 }
  0xfa   : > { %v732_v4 = vadd.f32 %v731_v57, %v563_v11 }
  0xfc   : > { %1548 = vtanh.f32 %v732_v4 }
 0x102   : > { %v1549_v17 = vpop.eup %1548 }
 0x103   : > { %v735_v18 = vmul.f32 %v1549_v17, %v734_v15  ;;  %v1096_v15 = vld [vmem:[#allocation4 + $0x168] sm:$0xff]  ;;  %v1093_v17 = vld [vmem:[#allocation4 + $0x150] sm:$0xff] }
 0x104   : > { %1099 = vmatpush.msra.mxu0 %v1096_v15  ;;  %v1067_v15 = vld [vmem:[#allocation4 + $0x80] sm:$0xff] }
 0x105   : > { %v2178_v21 = vadd.f32 %v736_v19, %v735_v18 }
 0x106   : > { %1100 = vmatpush.msra.mxu0 %v1093_v17  ;;  %v1068_v17 = vld [vmem:[#allocation4 + $0x88] sm:$0xff] }
 0x107   : > { %803 = vmatmul.f32.vlgmr.msrb.gmra.mxu2 %v2178_v21  ;;  %823 = vmatmul.f32.vlgmr.msrb.gmra.mxu3 %v2178_v21 }
 0x108   : > { %843 = vmatmul.f32.vlgmr.msrb.gmra.mxu0 %v2178_v21  ;;  %1139 = vmatpush.msrb.mxu2 %v1957_v7  ;;  %v1226_v7 = vld [vmem:[%s2359_s5 + $0x68] sm:$0xff] }
 0x109   : > { %1233 = vmatpush.msrb.mxu3 %v1228_v45  ;;  %v1090_v45 = vld [vmem:[#allocation4 + $0x138] sm:$0xff] }
 0x10a   : > { %1140 = vmatpush.msrb.mxu2 %v1969_v16  ;;  %v1225_v16 = vld [vmem:[%s2359_s5 + $0x60] sm:$0xff]  ;;  %1101 = vmatpush.msra.mxu0 %v1090_v45  ;;  %v1065_v45 = vld [vmem:[#allocation4 + $0x70] sm:$0xff] }
 0x10b   : > { %1234 = vmatpush.msrb.mxu3 %v1227_v25 }
 0x10c   : > { %1141 = vmatpush.msrb.mxu2 %v1980_v26 }
 0x10d   : > { %1235 = vmatpush.msrb.mxu3 %v1226_v7 }
 0x10f   : > { %1236 = vmatpush.msrb.mxu3 %v1225_v16 }
 0x111   : > { %1237 = vmatpush.msrb.mxu3 %v1224_v34  ;;  %v1087_v34 = vld [vmem:[#allocation4 + $0x120] sm:$0xff] }
 0x112   : > { %1102 = vmatpush.msra.mxu0 %v1087_v34  ;;  %v1059_v34 = vld [vmem:[#allocation4 + $0x40] sm:$0xff] }
 0x113   : > { %1238 = vmatpush.msrb.mxu3 %v1223_v36  ;;  %v1084_v36 = vld [vmem:[#allocation4 + $0x108] sm:$0xff] }
 0x114   : > { %1103 = vmatpush.msra.mxu0 %v1084_v36  ;;  %v1272_v36 = vld [vmem:[%s2361_s7 + $0x30] sm:$0xff] }
 0x115   : > { %1239 = vmatpush.msrb.mxu3 %v1222_v40  ;;  %v1075_v40 = vld [vmem:[#allocation4 + $0xc0] sm:$0xff] }
 0x117   : > { %1240 = vmatpush.msrb.mxu3 %v1221_v53  ;;  %v1066_v53 = vld [vmem:[#allocation4 + $0x78] sm:$0xff] }
 0x119   : > { %1241 = vmatpush.msrb.mxu3 %v1220_v56  ;;  %v1063_v56 = vld [vmem:[#allocation4 + $0x60] sm:$0xff] }
 0x185   : > { %v844_v5 = vpop.f32.mrf.mxu0 }
 0x186   : > { %v845_v20 = vadd.f32 %v844_v5, %v2173_v59  ;;  %v1278_v5 = vld [vmem:[%s2361_s7 + $0x60] sm:$0xff] }
 0x18a   : > { %v804_v26 = vpop.f32.mrf.mxu2  ;;  %v824_v30 = vpop.f32.mrf.mxu3 }
 0x18b   : > { %v805_v31 = vadd.f32 %v804_v26, %v2148_v12  ;;  %v825_v33 = vadd.f32 %v824_v30, %v2157_v28 }
 0x18d   : > { %v847_v37 = vadd.f32 %v805_v31, %v2150_v14  ;;  %v867_v39 = vadd.f32 %v825_v33, %v2160_v50  ;;  %v1219_v14 = vld [vmem:[%s2359_s5 + $0x30] sm:$0xff]  ;;  %v1218_v50 = vld [vmem:[%s2359_s5 + $0x28] sm:$0xff] }
 0x18e   : > { %1242 = vmatpush.msrb.mxu3 %v1219_v14  ;;  %v1060_v14 = vld [vmem:[#allocation4 + $0x48] sm:$0xff] }
 0x18f   : > { %v1491_v42 = vmul.f32 -1.442695, %v847_v37  ;;  %v1492_v47 = vmul.f32 -1.442695, %v867_v39  ;;  %v1081_v37 = vld [vmem:[#allocation4 + $0xf0] sm:$0xff]  ;;  %v1078_v39 = vld [vmem:[#allocation4 + $0xd8] sm:$0xff] }
 0x190   : > { %1243 = vmatpush.msrb.mxu3 %v1218_v50  ;;  %1104 = vmatpush.msra.mxu0 %v1081_v37  ;;  %v1094_v50 = vld [vmem:[#allocation4 + $0x158] sm:$0xff]  ;;  %v1055_v37 = vld [vmem:[#allocation4 + $0x20] sm:$0xff] }
 0x191   : > { %1550 = vpow2.f32 %v1491_v42  ;;  %v1072_v42 = vld [vmem:[#allocation4 + $0xa8] sm:$0xff] }
 0x192   : > { %1552 = vpow2.f32 %v1492_v47  ;;  %1244 = vmatpush.msrb.mxu3 %v1217_v63  ;;  %1105 = vmatpush.msra.mxu0 %v1078_v39  ;;  %v1069_v47 = vld [vmem:[#allocation4 + $0x90] sm:$0xff]  ;;  %v1091_v63 = vld [vmem:[#allocation4 + $0x140] sm:$0xff]  ;;  %v1056_v39 = vld [vmem:[#allocation4 + $0x28] sm:$0xff] }
 0x194   : > { %1245 = vmatpush.msrb.mxu3 %v1216_v38  ;;  %1106 = vmatpush.msra.mxu0 %v1075_v40  ;;  %v1051_v38 = vld [vmem:[#allocation4] sm:$0xff] }
 0x195   : > { %v1271_v40 = vld [vmem:[%s2361_s7 + $0x28] sm:$0xff] }
 0x196   : > { %1246 = vmatpush.msrb.mxu3 %v1215_v41  ;;  %1107 = vmatpush.msra.mxu0 %v1072_v42  ;;  %v1085_v41 = vld [vmem:[#allocation4 + $0x110] sm:$0xff] }
 0x197   : > { %v1551_v60 = vpop.eup %1550 }
 0x198   : > { %v1553_v9 = vpop.eup %1552  ;;  %v851_v23 = vadd.f32 1.0, %v1551_v60  ;;  %1247 = vmatpush.msrb.mxu3 %v1214_v43  ;;  %1108 = vmatpush.msra.mxu0 %v1069_v47  ;;  %v1057_v60 = vld [vmem:[#allocation4 + $0x30] sm:$0xff]  ;;  %v1086_v43 = vld [vmem:[#allocation4 + $0x118] sm:$0xff]  ;;  %v1052_v47 = vld [vmem:[#allocation4 + $0x8] sm:$0xff] }
 0x199   : > { %v871_v32 = vadd.f32 1.0, %v1553_v9  ;;  %v1054_v9 = vld [vmem:[#allocation4 + $0x18] sm:$0xff] }
 0x19a   : > { %1554 = vrcp.f32 %v851_v23  ;;  %1248 = vmatpush.msrb.mxu3 %v1213_v46  ;;  %v863_v62 = vand.u32 2147483648, %v851_v23  ;;  %v861_v3 = vand.u32 2147483647, %v851_v23  ;;  %vm857_vm9 = vweird.f32 %v851_v23  ;;  %1109 = vmatpush.msra.mxu0 %v1066_v53  ;;  %v1281_v46 = vld [vmem:[%s2361_s7 + $0x78] sm:$0xff] }
 0x19b   : > { %1556 = vrcp.f32 %v871_v32  ;;  %v883_v10 = vand.u32 2147483648, %v871_v32  ;;  %vm877_vm13 = vweird.f32 %v871_v32  ;;  %v881_v18 = vand.u32 2147483647, %v871_v32  ;;  %v1053_v53 = vld [vmem:[#allocation4 + $0x10] sm:$0xff] }
 0x19c   : > { %v864_v13 = vor.u32 1.1754944e-38, %v863_v62  ;;  %vm862_vm11 = vcmp.eq.f32.partialorder %v861_v3, 8.507059e+37  ;;  %1110 = vmatpush.msra.mxu0 %v1063_v56  ;;  %v1279_v62 = vld [vmem:[%s2361_s7 + $0x68] sm:$0xff]  ;;  %v1077_v3 = vld [vmem:[#allocation4 + $0xd0] sm:$0xff]  ;;  %v1270_v56 = vld [vmem:[%s2361_s7 + $0x20] sm:$0xff] }
 0x19d   : > { %v884_v7 = vor.u32 1.1754944e-38, %v883_v10  ;;  %vm882_vm15 = vcmp.eq.f32.partialorder %v881_v18, 8.507059e+37 }
 0x19e   : > { %1111 = vmatpush.msra.mxu0 %v1060_v14 }
 0x1a0   : > { %v1555_v49 = vpop.eup %1554  ;;  %1112 = vmatpush.msra.mxu0 %v1057_v60 }
 0x1a1   : > { %v1557_v52 = vpop.eup %1556  ;;  %v853_v54 = vmul.f32 %v1555_v49, %v851_v23  ;;  %vm858_vm8 = vweird.f32 %v1555_v49  ;;  %v1088_v23 = vld [vmem:[#allocation4 + $0x128] sm:$0xff] }
 0x1a2   : > { %v873_v55 = vmul.f32 %v1557_v52, %v871_v32  ;;  %vm859_vm10 = vmor %vm857_vm9, %vm858_vm8  ;;  %vm878_vm12 = vweird.f32 %v1557_v52  ;;  %1113 = vmatpush.msra.mxu0 %v1054_v9  ;;  %v1089_v32 = vld [vmem:[#allocation4 + $0x130] sm:$0xff] }
 0x1a3   : > { %v854_v61 = vsub.f32 1.0, %v853_v54  ;;  %vm879_vm14 = vmor %vm877_vm13, %vm878_vm12  ;;  %1142 = vmatpush.msrb.mxu2 %v1089_v32  ;;  %v1280_v54 = vld [vmem:[%s2361_s7 + $0x70] sm:$0xff]  ;;  %v1266_v32 = vld [vmem:[%s2361_s7] sm:$0xff] }
 0x1a4   : > { %v874_v0 = vsub.f32 1.0, %v873_v55  ;;  %1114 = vmatpush.msra.mxu0 %v1051_v38  ;;  %v1079_v55 = vld [vmem:[#allocation4 + $0xe0] sm:$0xff] }
 0x1a5   : > { %v855_v1 = vmul.f32 %v1555_v49, %v854_v61  ;;  %1143 = vmatpush.msrb.mxu2 %v1086_v43  ;;  %v1080_v61 = vld [vmem:[#allocation4 + $0xe8] sm:$0xff] }
 0x1a6   : > { %v875_v11 = vmul.f32 %v1557_v52, %v874_v0  ;;  %1286 = vmatpush.msrb.mxu0 %v1281_v46 }
 0x1a7   : > { %v856_v44 = vadd.f32 %v1555_v49, %v855_v1  ;;  %v1076_v1 = vld [vmem:[#allocation4 + $0xc8] sm:$0xff] }
 0x1a8   : > { %v876_v4 = vadd.f32 %v1557_v52, %v875_v11  ;;  %1287 = vmatpush.msrb.mxu0 %v1280_v54 }
 0x1a9   : > { %v860_v57 = vsel %vm859_vm10, %v1555_v49, %v856_v44  ;;  %v1082_v49 = vld [vmem:[#allocation4 + $0xf8] sm:$0xff]  ;;  %v1073_v44 = vld [vmem:[#allocation4 + $0xb0] sm:$0xff] }
 0x1aa   : > { %v865_v2 = vsel %vm862_vm11, %v864_v13, %v860_v57  ;;  %v880_v25 = vsel %vm879_vm14, %v1557_v52, %v876_v4  ;;  %v1083_v52 = vld [vmem:[#allocation4 + $0x100] sm:$0xff]  ;;  %1288 = vmatpush.msrb.mxu0 %v1279_v62  ;;  %v1074_v13 = vld [vmem:[#allocation4 + $0xb8] sm:$0xff] }
 0x1ab   : > { %v887_v8 = vmul.f32 %v865_v2, %v845_v20  ;;  %v885_v16 = vsel %vm882_vm15, %v884_v7, %v880_v25  ;;  %1144 = vmatpush.msrb.mxu2 %v1083_v52  ;;  %v1277_v20 = vld [vmem:[%s2361_s7 + $0x58] sm:$0xff]  ;;  %v1070_v2 = vld [vmem:[#allocation4 + $0x98] sm:$0xff]  ;;  %v1071_v4 = vld [vmem:[#allocation4 + $0xa0] sm:$0xff] }
 0x1ac   : > { %v890_v26 = vsub.f32 1.0, %v885_v16  ;;  %v892_v31 = vmul.f32 %v885_v16, %v2178_v21  ;;  %1289 = vmatpush.msrb.mxu0 %v1278_v5  ;;  %v1274_v25 = vld [vmem:[%s2361_s7 + $0x40] sm:$0xff]  ;;  %v1061_v16 = vld [vmem:[#allocation4 + $0x50] sm:$0xff] }
 0x1ad   : > { %v888_v19 = vadd.f32 %v887_v8, %v566_v6  ;;  %1145 = vmatpush.msrb.mxu2 %v1080_v61  ;;  %v1276_v6 = vld [vmem:[%s2361_s7 + $0x50] sm:$0xff] }
 0x1ae   : > { %1290 = vmatpush.msrb.mxu0 %v1277_v20 }
 0x1af   : > { %1558 = vtanh.f32 %v888_v19  ;;  %1146 = vmatpush.msrb.mxu2 %v1077_v3  ;;  %v1064_v19 = vld [vmem:[#allocation4 + $0x68] sm:$0xff] }
 0x1b0   : > { %1291 = vmatpush.msrb.mxu0 %v1276_v6 }
 0x1b1   : > { %1147 = vmatpush.msrb.mxu2 %v1074_v13 }
 0x1b3   : > { %1148 = vmatpush.msrb.mxu2 %v1071_v4 }
 0x1b5   : > { %v1559_v30 = vpop.eup %1558  ;;  %1149 = vmatpush.msrb.mxu2 %v1068_v17 }
 0x1b6   : > { %v891_v35 = vmul.f32 %v1559_v30, %v890_v26  ;;  %v1062_v26 = vld [vmem:[#allocation4 + $0x58] sm:$0xff]  ;;  %v1273_v30 = vld [vmem:[%s2361_s7 + $0x38] sm:$0xff] }
 0x1b7   : > { %1150 = vmatpush.msrb.mxu2 %v1065_v45 }
 0x1b8   : > { %v2244_v33 = vadd.f32 %v892_v31, %v891_v35  ;;  %v1058_v31 = vld [vmem:[#allocation4 + $0x38] sm:$0xff] }
 0x1b9   : > { %1151 = vmatpush.msrb.mxu2 %v1062_v26 }
 0x1ba   : > { %959 = vmatmul.f32.vlgmr.msrb.gmra.mxu1 %v2244_v33  ;;  %979 = vmatmul.f32.vlgmr.msra.gmra.mxu2 %v2244_v33 }
 0x1bb   : > { %999 = vmatmul.f32.vlgmr.msra.gmra.mxu3 %v2244_v33  ;;  %1152 = vmatpush.msrb.mxu2 %v1059_v34 }
 0x1bd   : > { %1153 = vmatpush.msrb.mxu2 %v1056_v39 }
 0x1bf   : > { %1154 = vmatpush.msrb.mxu2 %v1053_v53 }
 0x1c3   : > { %1249 = vmatmul.f32.vlgmr.msrb.gmra.mxu3 %v2178_v21  ;;  %v1097_v21 = vld [vmem:[#allocation4 + $0x170] sm:$0xff] }
 0x1c4   : > { %1119 = vmatpush.msra.mxu1 %v1097_v21  ;;  %v1269_v21 = vld [vmem:[%s2361_s7 + $0x18] sm:$0xff] }
 0x1c6   : > { %1120 = vmatpush.msra.mxu1 %v1094_v50  ;;  %v1268_v50 = vld [vmem:[%s2361_s7 + $0x10] sm:$0xff] }
 0x1c8   : > { %1121 = vmatpush.msra.mxu1 %v1091_v63  ;;  %v1267_v63 = vld [vmem:[%s2361_s7 + $0x8] sm:$0xff] }
 0x1ca   : > { %1122 = vmatpush.msra.mxu1 %v1088_v23 }
 0x1cb   : > { %1252 = vmatmul.f32.gmra.mxu3 %v2244_v33 }
 0x1cc   : > { %1123 = vmatpush.msra.mxu1 %v1085_v41 }
 0x1ce   : > { %1124 = vmatpush.msra.mxu1 %v1082_v49 }
 0x1d0   : > { %1125 = vmatpush.msra.mxu1 %v1079_v55 }
 0x1d2   : > { %1126 = vmatpush.msra.mxu1 %v1076_v1 }
 0x1d4   : > { %1127 = vmatpush.msra.mxu1 %v1073_v44 }
 0x1d6   : > { %1128 = vmatpush.msra.mxu1 %v1070_v2 }
 0x1d8   : > { %1129 = vmatpush.msra.mxu1 %v1067_v15 }
 0x1da   : > { %1130 = vmatpush.msra.mxu1 %v1064_v19 }
 0x1dc   : > { %1131 = vmatpush.msra.mxu1 %v1061_v16 }
 0x1de   : > { %1132 = vmatpush.msra.mxu1 %v1058_v31 }
 0x1e0   : > { %1133 = vmatpush.msra.mxu1 %v1055_v37  ;;  %v2326_v37 = vld [vmem:[%s2362_s8] ss:$0 sm:$0xff] }
 0x1e2   : > { %1134 = vmatpush.msra.mxu1 %v1052_v47 }
 0x237   : > { %v960_v0 = vpop.f32.mrf.mxu1 }
 0x238   : > { %v961_v11 = vadd.f32 %v960_v0, %v2148_v12 }
 0x23a   : > { %v1003_v57 = vadd.f32 %v961_v11, %v2153_v22  ;;  %v1275_v22 = vld [vmem:[%s2361_s7 + $0x48] sm:$0xff] }
 0x23b   : > { %1292 = vmatpush.msrb.mxu0 %v1275_v22 }
 0x23c   : > { %v1493_v8 = vmul.f32 -1.442695, %v1003_v57 }
 0x23d   : > { %v980_v10 = vpop.f32.mrf.mxu2  ;;  %1293 = vmatpush.msrb.mxu0 %v1274_v25 }
 0x23e   : > { %1560 = vpow2.f32 %v1493_v8  ;;  %v981_v18 = vadd.f32 %v980_v10, %v2157_v28  ;;  %v1000_v52 = vpop.f32.mrf.mxu3 }
 0x23f   : > { %1294 = vmatpush.msrb.mxu0 %v1273_v30  ;;  %v1001_v0 = vadd.f32 %v1000_v52, %v2173_v59 }
 0x240   : > { %v1023_v7 = vadd.f32 %v981_v18, %v2162_v29  ;;  %v2309_v18 = vld [vmem:[%s2360_s6] ss:$0 sm:$0xff] }
 0x241   : > { %1295 = vmatpush.msrb.mxu0 %v1272_v36 }
 0x242   : > { %v1494_v35 = vmul.f32 -1.442695, %v1023_v7 }
 0x243   : > { %1296 = vmatpush.msrb.mxu0 %v1271_v40 }
 0x244   : > { %v1561_v29 = vpop.eup %1560  ;;  %1562 = vpow2.f32 %v1494_v35 }
 0x245   : > { %v1007_v42 = vadd.f32 1.0, %v1561_v29  ;;  %1297 = vmatpush.msrb.mxu0 %v1270_v56 }
 0x246   : > { %v1250_v22 = vpop.f32.mrf.mxu3 }
 0x247   : > { %1564 = vrcp.f32 %v1007_v42  ;;  %1298 = vmatpush.msrb.mxu0 %v1269_v21  ;;  %v1019_v41 = vand.u32 2147483648, %v1007_v42  ;;  %v1017_v46 = vand.u32 2147483647, %v1007_v42  ;;  %vm1013_vm1 = vweird.f32 %v1007_v42 }
 0x249   : > { %1299 = vmatpush.msrb.mxu0 %v1268_v50  ;;  %v1020_v61 = vor.u32 1.1754944e-38, %v1019_v41  ;;  %vm1018_vm3 = vcmp.eq.f32.partialorder %v1017_v46, 8.507059e+37 }
 0x24a   : > { %v1563_v14 = vpop.eup %1562 }
 0x24b   : > { %v1027_v60 = vadd.f32 1.0, %v1563_v14  ;;  %1300 = vmatpush.msrb.mxu0 %v1267_v63 }
 0x24d   : > { %v1565_v9 = vpop.eup %1564  ;;  %1566 = vrcp.f32 %v1027_v60  ;;  %1301 = vmatpush.msrb.mxu0 %v1266_v32  ;;  %v1039_v11 = vand.u32 2147483648, %v1027_v60  ;;  %v1037_v13 = vand.u32 2147483647, %v1027_v60  ;;  %vm1033_vm5 = vweird.f32 %v1027_v60 }
 0x24e   : > { %v1009_v23 = vmul.f32 %v1565_v9, %v1007_v42  ;;  %vm1014_vm0 = vweird.f32 %v1565_v9 }
 0x24f   : > { %vm1015_vm2 = vmor %vm1013_vm1, %vm1014_vm0  ;;  %v1040_v2 = vor.u32 1.1754944e-38, %v1039_v11  ;;  %vm1038_vm7 = vcmp.eq.f32.partialorder %v1037_v13, 8.507059e+37 }
 0x250   : > { %v1010_v38 = vsub.f32 1.0, %v1009_v23 }
 0x252   : > { %v1011_v43 = vmul.f32 %v1565_v9, %v1010_v38 }
 0x253   : > { %v1567_v49 = vpop.eup %1566 }
 0x254   : > { %v1029_v54 = vmul.f32 %v1567_v49, %v1027_v60  ;;  %v1012_v55 = vadd.f32 %v1565_v9, %v1011_v43  ;;  %vm1034_vm4 = vweird.f32 %v1567_v49 }
 0x255   : > { %vm1035_vm6 = vmor %vm1033_vm5, %vm1034_vm4 }
 0x256   : > { %v1030_v62 = vsub.f32 1.0, %v1029_v54  ;;  %v1016_v1 = vsel %vm1015_vm2, %v1565_v9, %v1012_v55 }
 0x257   : > { %v1021_v3 = vsel %vm1018_vm3, %v1020_v61, %v1016_v1 }
 0x258   : > { %v1031_v5 = vmul.f32 %v1567_v49, %v1030_v62  ;;  %v1043_v44 = vmul.f32 %v1021_v3, %v1001_v0  ;;  %v572_v0 = vadd.f32 %v2186_v24, %v2168_v51 }
 0x25a   : > { %v1032_v20 = vadd.f32 %v1567_v49, %v1031_v5  ;;  %v1044_v57 = vadd.f32 %v1043_v44, %v2171_v58  ;;  %v1251_v58 = vadd.f32 %v2309_v18, %v1250_v22 }
 0x25c   : > { %v1036_v4 = vsel %vm1035_vm6, %v1567_v49, %v1032_v20  ;;  %1568 = vtanh.f32 %v1044_v57  ;;  %v1262_v45 = vmax.f32 %v1251_v58, 0.0 }
 0x25d   : > { %v1041_v6 = vsel %vm1038_vm7, %v1040_v2, %v1036_v4 }
 0x25e   : > { %v1046_v8 = vsub.f32 1.0, %v1041_v6  ;;  %v1048_v17 = vmul.f32 %v1041_v6, %v2244_v33  ;;  %v1253_v33 = vpop.f32.mrf.mxu3 }
 0x25f   : > { %v1254_v25 = vadd.f32 %v2309_v18, %v1253_v33 }
 0x261   : > { %v1263_v7 = vmax.f32 %v1254_v25, 0.0 }
 0x262   : > { %v1569_v10 = vpop.eup %1568 }
 0x263   : > { %v1047_v15 = vmul.f32 %v1569_v10, %v1046_v8 }
 0x265   : > { %v2311_v19 = vadd.f32 %v1048_v17, %v1047_v15 }
 0x267   : > { %1115 = vmatmul.f32.vlgmr.msra.gmra.mxu0 %v2311_v19  ;;  %1135 = vmatmul.f32.vlgmr.msra.gmra.mxu1 %v2311_v19 }
 0x268   : > { %1155 = vmatmul.f32.vlgmr.msrb.gmra.mxu2 %v2311_v19  ;;  %1255 = vmatmul.f32.gmra.mxu3 %v2311_v19 }
 0x26f   : > { %1302 = vmatmul.f32.vlgmr.msrb.gmra.mxu0 %v1262_v45 }
 0x277   : > { %1305 = vmatmul.f32.gmra.mxu0 %v1263_v7 }
 0x2e4   : > { %v1116_v16 = vpop.f32.mrf.mxu0  ;;  %v1136_v26 = vpop.f32.mrf.mxu1 }
 0x2e5   : > { %v1117_v30 = vadd.f32 %v1116_v16, %v2148_v12  ;;  %v1137_v35 = vadd.f32 %v1136_v26, %v2157_v28 }
 0x2e7   : > { %v1159_v31 = vadd.f32 %v1117_v30, %v2155_v27  ;;  %v1179_v34 = vadd.f32 %v1137_v35, %v2166_v48 }
 0x2e9   : > { %v1495_v36 = vmul.f32 -1.442695, %v1159_v31  ;;  %v1496_v29 = vmul.f32 -1.442695, %v1179_v34 }
 0x2eb   : > { %1570 = vpow2.f32 %v1495_v36  ;;  %v1256_v39 = vpop.f32.mrf.mxu3  ;;  %v1156_v43 = vpop.f32.mrf.mxu2 }
 0x2ec   : > { %1572 = vpow2.f32 %v1496_v29  ;;  %v1257_v40 = vadd.f32 %v2309_v18, %v1256_v39  ;;  %v1303_v42 = vpop.f32.mrf.mxu0  ;;  %v1157_v54 = vadd.f32 %v1156_v43, %v2173_v59 }
 0x2ed   : > { %v1304_v12 = vadd.f32 %v2326_v37, %v1303_v42 }
 0x2ee   : > { %v1264_v28 = vmax.f32 %v1257_v40, 0.0 }
 0x2ef   : > { %1315 = vmax.xlane.f32.xlu0 %v1304_v12 }
 0x2f0   : > { %1308 = vmatmul.f32.gmra.mxu0 %v1264_v28 }
 0x2f1   : > { %v1571_v27 = vpop.eup %1570 }
 0x2f2   : > { %v1573_v48 = vpop.eup %1572  ;;  %v1163_v47 = vadd.f32 1.0, %v1571_v27 }
 0x2f3   : > { %v1183_v53 = vadd.f32 1.0, %v1573_v48 }
 0x2f4   : > { %1574 = vrcp.f32 %v1163_v47  ;;  %v1306_v56 = vpop.f32.mrf.mxu0  ;;  %v1175_v23 = vand.u32 2147483648, %v1163_v47  ;;  %v1173_v41 = vand.u32 2147483647, %v1163_v47  ;;  %vm1169_vm9 = vweird.f32 %v1163_v47 }
 0x2f5   : > { %1576 = vrcp.f32 %v1183_v53  ;;  %v1307_v21 = vadd.f32 %v2326_v37, %v1306_v56  ;;  %v1195_v3 = vand.u32 2147483648, %v1183_v53  ;;  %vm1189_vm13 = vweird.f32 %v1183_v53 }
 0x2f6   : > { %v1176_v52 = vor.u32 1.1754944e-38, %v1175_v23  ;;  %vm1174_vm11 = vcmp.eq.f32.partialorder %v1173_v41, 8.507059e+37  ;;  %v1193_v5 = vand.u32 2147483647, %v1183_v53 }
 0x2f7   : > { %1317 = vmax.xlane.f32.xlu0 %v1307_v21  ;;  %v1196_v13 = vor.u32 1.1754944e-38, %v1195_v3 }
 0x2f8   : > { %vm1194_vm15 = vcmp.eq.f32.partialorder %v1193_v5, 8.507059e+37 }
 0x2fa   : > { %v1575_v14 = vpop.eup %1574 }
 0x2fb   : > { %v1577_v50 = vpop.eup %1576  ;;  %v1165_v60 = vmul.f32 %v1575_v14, %v1163_v47  ;;  %vm1170_vm8 = vweird.f32 %v1575_v14 }
 0x2fc   : > { %v1185_v63 = vmul.f32 %v1577_v50, %v1183_v53  ;;  %vm1171_vm10 = vmor %vm1169_vm9, %vm1170_vm8  ;;  %vm1190_vm12 = vweird.f32 %v1577_v50 }
 0x2fd   : > { %v1166_v9 = vsub.f32 1.0, %v1165_v60  ;;  %vm1191_vm14 = vmor %vm1189_vm13, %vm1190_vm12 }
 0x2fe   : > { %v1186_v32 = vsub.f32 1.0, %v1185_v63 }
 0x2ff   : > { %v1167_v38 = vmul.f32 %v1575_v14, %v1166_v9 }
 0x300   : > { %v1187_v46 = vmul.f32 %v1577_v50, %v1186_v32 }
 0x301   : > { %v1168_v49 = vadd.f32 %v1575_v14, %v1167_v38 }
 0x302   : > { %v1188_v62 = vadd.f32 %v1577_v50, %v1187_v46 }
 0x303   : > { %v1172_v55 = vsel %vm1171_vm10, %v1575_v14, %v1168_v49 }
 0x304   : > { %v1177_v61 = vsel %vm1174_vm11, %v1176_v52, %v1172_v55  ;;  %v1192_v44 = vsel %vm1191_vm14, %v1577_v50, %v1188_v62 }
 0x305   : > { %v1199_v1 = vmul.f32 %v1177_v61, %v1157_v54  ;;  %v1197_v20 = vsel %vm1194_vm15, %v1196_v13, %v1192_v44 }
 0x306   : > { %v1202_v59 = vsub.f32 1.0, %v1197_v20  ;;  %v1204_v4 = vmul.f32 %v1197_v20, %v2311_v19 }
 0x307   : > { %v1200_v11 = vadd.f32 %v1199_v1, %v572_v0 }
 0x309   : > { %1578 = vtanh.f32 %v1200_v11 }
 0x30f   : > { %v1579_v57 = vpop.eup %1578 }
 0x310   : > { %v1203_v2 = vmul.f32 %v1579_v57, %v1202_v59 }
 0x312   : > { %v1205_v6 = vadd.f32 %v1204_v4, %v1203_v2 }
 0x314   : > { %1207 = vst [vmem:[#allocation3] sm:$0xff] %v1205_v6  ;;  %1258 = vmatmul.f32.gmra.mxu3 %v1205_v6 }
 0x315   : > { %1208 = vst [vmem:[%s2364_s10] sm:$0xff] %v1205_v6 }
 0x362   : > { %v1316_v51 = vpop.xlane.xlu0 %1315 }
 0x363   : > { %v1323_v24 = vsub.f32 %v1304_v12, %v1316_v51 }
 0x365   : > { %v1327_v8 = vmul.f32 1.442695, %v1323_v24 }
 0x367   : > { %1580 = vpow2.f32 %v1327_v8 }
 0x36a   : > { %v1318_v10 = vpop.xlane.xlu0 %1317 }
 0x36b   : > { %v1324_v15 = vsub.f32 %v1307_v21, %v1318_v10 }
 0x36d   : > { %v1581_v17 = vpop.eup %1580  ;;  %v1329_v22 = vmul.f32 1.442695, %v1324_v15  ;;  %v1309_v58 = vpop.f32.mrf.mxu0 }
 0x36e   : > { %v1310_v45 = vadd.f32 %v2326_v37, %v1309_v58  ;;  %1335 = vadd.xlane.f32.xlu2 %v1581_v17 }
 0x36f   : > { %1582 = vpow2.f32 %v1329_v22 }
 0x370   : > { %1319 = vmax.xlane.f32.xlu1 %v1310_v45 }
 0x375   : > { %v1583_v19 = vpop.eup %1582 }
 0x376   : > { %1337 = vadd.xlane.f32.xlu2 %v1583_v19 }
 0x397   : > { %v1259_v33 = vpop.f32.mrf.mxu3 }
 0x398   : > { %v1260_v25 = vadd.f32 %v2309_v18, %v1259_v33 }
 0x39a   : > { %v1265_v7 = vmax.f32 %v1260_v25, 0.0 }
 0x39c   : > { %1311 = vmatmul.f32.gmra.mxu0 %v1265_v7 }
 0x3e1   : > { %v1336_v16 = vpop.xlane.xlu2 %1335 }
 0x3e2   : > { %1584 = vlog2.f32 %v1336_v16 }
 0x3e3   : > { %v1320_v26 = vpop.xlane.xlu1 %1319 }
 0x3e4   : > { %v1325_v30 = vsub.f32 %v1310_v45, %v1320_v26 }
 0x3e6   : > { %v1331_v35 = vmul.f32 1.442695, %v1325_v30 }
 0x3e8   : > { %v1585_v31 = vpop.eup %1584  ;;  %1586 = vpow2.f32 %v1331_v35 }
 0x3e9   : > { %v1344_v34 = vmul.f32 0.6931472, %v1585_v31  ;;  %v1338_v36 = vpop.xlane.xlu2 %1337 }
 0x3ea   : > { %1588 = vlog2.f32 %v1338_v36 }
 0x3eb   : > { %v1351_v29 = vsub.f32 %v1323_v24, %v1344_v34 }
 0x3ed   : > { %1355 = vst [vmem:[%s1746_s12] sm:$0xff] %v1351_v29 }
 0x3ee   : > { %v1587_v39 = vpop.eup %1586 }
 0x3ef   : > { %1339 = vadd.xlane.f32.xlu0 %v1587_v39 }
 0x3f0   : > { %v1589_v40 = vpop.eup %1588 }
 0x3f1   : > { %v1346_v18 = vmul.f32 0.6931472, %v1589_v40 }
 0x3f3   : > { %v1352_v42 = vsub.f32 %v1324_v15, %v1346_v18 }
 0x3f5   : > { %1356 = vst [vmem:[%s1746_s12 + $0x8] sm:$0xff] %v1352_v42 }
 0x419   : > { %v1312_v12 = vpop.f32.mrf.mxu0 }
 0x41a   : > { %v1313_v28 = vadd.f32 %v2326_v37, %v1312_v12 }
 0x41c   : > { %1321 = vmax.xlane.f32.xlu1 %v1313_v28 }
 0x462   : > { %v1340_v27 = vpop.xlane.xlu0 %1339 }
 0x463   : > { %1590 = vlog2.f32 %v1340_v27 }
 0x469   : > { %v1591_v48 = vpop.eup %1590 }
 0x46a   : > { %v1348_v47 = vmul.f32 0.6931472, %v1591_v48 }
 0x46c   : > { %v1353_v53 = vsub.f32 %v1325_v30, %v1348_v47 }
 0x46e   : > { %1357 = vst [vmem:[%s1746_s12 + $0x10] sm:$0xff] %v1353_v53 }
 0x48f   : > { %v1322_v56 = vpop.xlane.xlu1 %1321 }
 0x490   : > { %v1326_v21 = vsub.f32 %v1313_v28, %v1322_v56 }
 0x492   : > { %v1333_v14 = vmul.f32 1.442695, %v1326_v21 }
 0x494   : > { %1592 = vpow2.f32 %v1333_v14 }
 0x49a   : > { %v1593_v50 = vpop.eup %1592 }
 0x49b   : > { %1341 = vadd.xlane.f32.xlu1 %v1593_v50 }
 0x50e   : > { %v1342_v60 = vpop.xlane.xlu1 %1341 }
 0x50f   : > { %1594 = vlog2.f32 %v1342_v60 }
 0x515   : > { %v1595_v63 = vpop.eup %1594 }
 0x516   : > { %v1350_v9 = vmul.f32 0.6931472, %v1595_v63 }
 0x518   : > { %v1354_v23 = vsub.f32 %v1326_v21, %v1350_v9 }
 0x51a   : > { %1358 = vst [vmem:[%s1746_s12 + $0x18] sm:$0xff] %v1354_v23 }
 0x51b PF: > { %s22_s15 = sadd.s32 1, %s1652_s15   ;;  %s2365_s13 = smov %s1648_s14 }
 0x51c   : > { %p19_p9 = scmp.ge.s32.totalorder %s22_s15, 4   ;;  %s2366_s14 = smov %s2368_s17 }
 0x51e   :  { %21 = sbr.rel (!%p19_p9) target bundleno = 2 (0x2), region = 107 }
 0x523   :  { %1401 = vsyncpa [#allocation5], 1 }
 0x524   :  { %1403 = vsyncpa [#allocation5 + $0x1], 1 }

</bundles_post_ra>
